<compile_context>
chip_gen: v5e
topology: v5e:2x2
jax: 0.10.0
libtpu: 0.0.40
codegen_flags: <defaults>
</compile_context>

<pallas_src>
import functools

import jax
import jax.numpy as jnp
import numpy as np
from jax import lax
from jax.experimental import pallas as pl
from jax.experimental.pallas import tpu as pltpu

EPS = 1e-5        # LayerNorm / InstanceNorm eps (PyTorch defaults)
K = 5             # conv kernel size
PAD = 2           # conv padding
CONV_IN = 3       # conv input channels (weighted-feat, rel-x, rel-y)
COORD_DIV = 32.0  # relative_coords / 32 in the reference module


def _and(a, b):
    if a is None:
        return b
    if b is None:
        return a
    return jnp.logical_and(a, b)


def spatial_atten_kernel(inds_ref,            # SMEM (B, 2) int32 [scalar prefetch] (y, x)
                         gf_ref,              # VMEM (1, C, H*W)  global features (flat spatial)
                         ip_ref,              # SMEM (B, Cin) f32 instance params
                         lw_ref,              # VMEM (C, Cin) f32 Linear weight (torch layout)
                         lb_ref,              # VMEM (C, 1) f32   Linear bias (column)
                         gamma_ref, beta_ref, # VMEM (C, 1) f32   LayerNorm affine (columns)
                         col_ref, row_ref,    # VMEM (1, H*W) f32 flattened x / y coordinate planes
                         cw_ref,              # SMEM (3, 25) f32  Conv2d(3,1,5,1,2) weight taps
                         cb_ref,              # SMEM (1,) f32     Conv2d bias
                         out_ref,             # VMEM (1, C, H*W)
                         *, H, W):
    b = pl.program_id(0)
    HW = H * W
    Cin = ip_ref.shape[1]

    gf0 = gf_ref[0].astype(jnp.float32)                        # (C, HW), resident for reuse

    # ---- Linear(in_channels -> out_channels) on instance params (column form, no MXU needed) ----
    lw = lw_ref[...].astype(jnp.float32)                       # (C, Cin)
    p = lb_ref[...].astype(jnp.float32)                        # (C, 1)
    for i in range(Cin):
        p = p + ip_ref[b, i].astype(jnp.float32) * lw[:, i:i + 1]

    # ---- LayerNorm over the channel dim (biased var, eps=1e-5) ----
    mu = jnp.mean(p, axis=0, keepdims=True)
    var = jnp.mean((p - mu) ** 2, axis=0, keepdims=True)
    p = (p - mu) * lax.rsqrt(var + EPS) * gamma_ref[...] + beta_ref[...]   # (C, 1)

    # ---- channel-weighted sum of global features: single lane-dense multiply + sublane reduce ----
    wsum = jnp.sum(gf0 * p, axis=0, keepdims=True)             # (1, HW)

    # ---- relative coordinates: grid-invariant planes passed in, only scalar offsets per step ----
    colf = col_ref[...]                                        # (1, HW) x coordinate of each pos
    rowf = row_ref[...]                                        # (1, HW) y coordinate of each pos
    ix = inds_ref[b, 1].astype(jnp.float32)                    # flip(inds) -> (x, y)
    iy = inds_ref[b, 0].astype(jnp.float32)
    relx = (ix - colf) * (1.0 / COORD_DIV)
    rely = (iy - rowf) * (1.0 / COORD_DIV)

    inp3 = jnp.concatenate([wsum, relx, rely], axis=0)         # (3, HW) conv input channels

    # ---- Conv2d(3, 1, 5, 1, 2): register-resident taps via lane rolls + zero-pad border masks ----
    col_ok = {}
    row_ok = {}
    for d in range(-PAD, PAD + 1):
        col_ok[d] = None if d == 0 else (colf >= -d if d < 0 else colf < (W - d))
        row_ok[d] = None if d == 0 else (rowf >= -d if d < 0 else rowf < (H - d))

    acc = jnp.zeros((1, HW), jnp.float32) + cb_ref[0]
    for ky in range(K):
        dy = ky - PAD
        for kx in range(K):
            dx = kx - PAD
            t = ky * K + kx
            # roll so position j reads flat index j + dy*W + dx; wrapped lanes are masked to 0
            shift = (-(dy * W + dx)) % HW
            rolled = inp3 if shift == 0 else pltpu.roll(inp3, shift, axis=1)
            valid = _and(row_ok[dy], col_ok[dx])
            tap = rolled if valid is None else jnp.where(valid, rolled, 0.0)
            acc = (acc
                   + cw_ref[0, t] * tap[0:1, :]
                   + cw_ref[1, t] * tap[1:2, :]
                   + cw_ref[2, t] * tap[2:3, :])

    # ---- InstanceNorm2d(1), affine=False: normalize over spatial positions ----
    m = jnp.mean(acc, axis=-1, keepdims=True)
    v = jnp.mean((acc - m) ** 2, axis=-1, keepdims=True)
    mask = (acc - m) * lax.rsqrt(v + EPS)                      # (1, HW)

    # ---- spatial attention: single lane-dense broadcast multiply + unmasked store ----
    out_ref[0] = (gf0 * mask).astype(out_ref.dtype)


def spatial_atten(gf, ip, inds, lw, lb, gamma, beta, cw, cb):
    B, C, H, W = gf.shape
    Cin = ip.shape[1]
    HW = H * W

    # Lane-dense layout: flatten spatial dims so the minor dim is H*W.
    gf_flat = gf.reshape(B, C, HW)
    # Column layouts for the tiny per-channel parameters (one-time XLA transposes).
    lw_c = jnp.transpose(lw)          # (C, Cin), torch-native Linear weight layout
    lb_c = jnp.transpose(lb)          # (C, 1)
    gamma_c = jnp.transpose(gamma)    # (C, 1)
    beta_c = jnp.transpose(beta)      # (C, 1)
    # Grid-invariant coordinate planes (hoisted out of the kernel; fetched once, block idx constant).
    col = jnp.tile(jnp.arange(W, dtype=jnp.float32), H).reshape(1, HW)
    row = jnp.repeat(jnp.arange(H, dtype=jnp.float32), W).reshape(1, HW)

    kernel = functools.partial(spatial_atten_kernel, H=H, W=W)

    grid_spec = pltpu.PrefetchScalarGridSpec(
        num_scalar_prefetch=1,                 # instance_inds lands in SMEM
        grid=(B,),
        in_specs=[
            pl.BlockSpec((1, C, HW), lambda b, inds_r: (b, 0, 0)),      # global features (flat)
            pl.BlockSpec(memory_space=pltpu.MemorySpace.SMEM),          # instance params
            pl.BlockSpec((C, Cin), lambda b, inds_r: (0, 0)),           # linear weight
            pl.BlockSpec((C, 1), lambda b, inds_r: (0, 0)),             # linear bias
            pl.BlockSpec((C, 1), lambda b, inds_r: (0, 0)),             # ln gamma
            pl.BlockSpec((C, 1), lambda b, inds_r: (0, 0)),             # ln beta
            pl.BlockSpec((1, HW), lambda b, inds_r: (0, 0)),            # x-coordinate plane
            pl.BlockSpec((1, HW), lambda b, inds_r: (0, 0)),            # y-coordinate plane
            pl.BlockSpec(memory_space=pltpu.MemorySpace.SMEM),          # conv weight taps
            pl.BlockSpec(memory_space=pltpu.MemorySpace.SMEM),          # conv bias
        ],
        out_specs=pl.BlockSpec((1, C, HW), lambda b, inds_r: (b, 0, 0)),
    )
    out_flat = pl.pallas_call(
        kernel,
        out_shape=jax.ShapeDtypeStruct((B, C, HW), gf.dtype),
        grid_spec=grid_spec,
        compiler_params=pltpu.CompilerParams(
            dimension_semantics=("parallel",)),   # instances independent -> v7x megacore sharding
    )(inds, gf_flat, ip, lw_c, lb_c, gamma_c, beta_c, col, row, cw, cb)
    return out_flat.reshape(B, C, H, W)


def spatial_atten_reference(gf, ip, inds, lw, lb, gamma, beta, cw, cb):
    """Pure-JAX reference mirroring the PyTorch forward pass."""
    B, C, H, W = gf.shape
    p = ip.astype(jnp.float32) @ lw + lb                       # Linear (lw == torch weight^T)
    mu = p.mean(-1, keepdims=True)
    var = ((p - mu) ** 2).mean(-1, keepdims=True)
    p = (p - mu) / jnp.sqrt(var + EPS) * gamma + beta          # LayerNorm
    feats = gf * p[:, :, None, None]
    input_feats = feats.sum(axis=1, keepdims=True)             # (B,1,H,W)
    row, col = jnp.meshgrid(jnp.arange(H, dtype=jnp.float32),
                            jnp.arange(W, dtype=jnp.float32), indexing="ij")
    ix = inds[:, 1].astype(jnp.float32)[:, None, None]
    iy = inds[:, 0].astype(jnp.float32)[:, None, None]
    relx = (ix - col[None]) / COORD_DIV
    rely = (iy - row[None]) / COORD_DIV
    inp = jnp.concatenate([input_feats, relx[:, None], rely[:, None]], axis=1)
    mask = lax.conv_general_dilated(
        inp, cw.reshape(1, CONV_IN, K, K), (1, 1), ((PAD, PAD), (PAD, PAD)),
        dimension_numbers=("NCHW", "OIHW", "NCHW")) + cb.reshape(1, 1, 1, 1)
    m = mask.mean(axis=(2, 3), keepdims=True)
    v = ((mask - m) ** 2).mean(axis=(2, 3), keepdims=True)
    mask = (mask - m) / jnp.sqrt(v + EPS)
    return gf * mask


if __name__ == "__main__":
    B, C, H, W = 2, 4, 16, 16      # B == n_inst (required by the module's cat)
    Cin = 4                        # in_channels; out_channels == C

    key = jax.random.PRNGKey(0)
    ks = jax.random.split(key, 8)
    gf = jax.random.normal(ks[0], (B, C, H, W), jnp.float32)
    ip = jax.random.normal(ks[1], (B, Cin), jnp.float32)
    inds = jax.random.randint(ks[2], (B, 2), 0, H).astype(jnp.int32)       # (y, x) per instance

    # Deterministic synthetic parameters (shapes from __init__); lw is torch weight transposed.
    lw = 0.5 * jax.random.normal(ks[3], (Cin, C), jnp.float32)
    lb = 0.1 * jax.random.normal(ks[4], (1, C), jnp.float32)
    gamma = 1.0 + 0.1 * jax.random.normal(ks[5], (1, C), jnp.float32)
    beta = 0.1 * jax.random.normal(ks[6], (1, C), jnp.float32)
    cw = 0.2 * jax.random.normal(ks[7], (CONV_IN, K * K), jnp.float32)     # Conv2d(3,1,5) taps
    cb = jnp.array([0.05], jnp.float32)

    out = spatial_atten(gf, ip, inds, lw, lb, gamma, beta, cw, cb)
    out = jax.block_until_ready(out)

    ref = spatial_atten_reference(gf, ip, inds, lw, lb, gamma, beta, cw, cb)
    assert out.shape == (B, C, H, W)
    np.testing.assert_allclose(np.asarray(out), np.asarray(ref), rtol=2e-3, atol=2e-3)
    print("KERNEL_OK")
</pallas_src>

<mosaic_0001>
module attributes {stable_mosaic.version = 11 : i64} {
  func.func @spatial_atten_kernel(%arg0: i32, %arg1: memref<2x2xi32, #tpu.memory_space<smem>>, %arg2: memref<1x4x256xf32, #tpu.memory_space<vmem>>, %arg3: memref<2x4xf32, #tpu.memory_space<smem>>, %arg4: memref<4x4xf32, #tpu.memory_space<vmem>>, %arg5: memref<4x1xf32, #tpu.memory_space<vmem>>, %arg6: memref<4x1xf32, #tpu.memory_space<vmem>>, %arg7: memref<4x1xf32, #tpu.memory_space<vmem>>, %arg8: memref<1x256xf32, #tpu.memory_space<vmem>>, %arg9: memref<1x256xf32, #tpu.memory_space<vmem>>, %arg10: memref<3x25xf32, #tpu.memory_space<smem>>, %arg11: memref<1xf32, #tpu.memory_space<smem>>, %arg12: memref<1x4x256xf32, #tpu.memory_space<vmem>>) attributes {dimension_semantics = [#tpu.dimension_semantics<parallel>], iteration_bounds = array<i64: 2>, scalar_prefetch = 1 : i64, scratch_operands = 0 : i64, tpu.core_type = #tpu.core_type<tc>, window_params = [{transform_indices = @transform_0, window_bounds = array<i64: 1, 4, 256>}, {transform_indices = @transform_1, window_bounds = array<i64: 2, 4>}, {pipeline_mode = #tpu.pipeline_mode<synchronous>, transform_indices = @transform_2, window_bounds = array<i64: 4, 4>}, {pipeline_mode = #tpu.pipeline_mode<synchronous>, transform_indices = @transform_3, window_bounds = array<i64: 4, 1>}, {pipeline_mode = #tpu.pipeline_mode<synchronous>, transform_indices = @transform_4, window_bounds = array<i64: 4, 1>}, {pipeline_mode = #tpu.pipeline_mode<synchronous>, transform_indices = @transform_5, window_bounds = array<i64: 4, 1>}, {pipeline_mode = #tpu.pipeline_mode<synchronous>, transform_indices = @transform_6, window_bounds = array<i64: 1, 256>}, {pipeline_mode = #tpu.pipeline_mode<synchronous>, transform_indices = @transform_7, window_bounds = array<i64: 1, 256>}, {transform_indices = @transform_8, window_bounds = array<i64: 3, 25>}, {transform_indices = @transform_9, window_bounds = array<i64: 1>}, {transform_indices = @transform_10, window_bounds = array<i64: 1, 4, 256>}]} {
    %c0 = arith.constant 0 : index
    %c0_0 = arith.constant 0 : index
    %c0_1 = arith.constant 0 : index
    %0 = vector.load %arg2[%c0, %c0_0, %c0_1] : memref<1x4x256xf32, #tpu.memory_space<vmem>>, vector<1x4x256xf32>
    %1 = vector.shape_cast %0 : vector<1x4x256xf32> to vector<4x256xf32>
    %c0_2 = arith.constant 0 : index
    %c0_3 = arith.constant 0 : index
    %2 = vector.load %arg4[%c0_2, %c0_3] : memref<4x4xf32, #tpu.memory_space<vmem>>, vector<4x4xf32>
    %c0_4 = arith.constant 0 : index
    %c0_5 = arith.constant 0 : index
    %3 = vector.load %arg5[%c0_4, %c0_5] : memref<4x1xf32, #tpu.memory_space<vmem>>, vector<4x1xf32>
    %4 = arith.index_cast %arg0 : i32 to index
    %c0_6 = arith.constant 0 : index
    %5 = memref.load %arg3[%4, %c0_6] : memref<2x4xf32, #tpu.memory_space<smem>>
    %6 = vector.extract_strided_slice %2 {offsets = [0, 0], sizes = [4, 1], strides = [1, 1]} : vector<4x4xf32> to vector<4x1xf32>
    %7 = vector.broadcast %5 : f32 to vector<4x1xf32>
    %8 = arith.mulf %7, %6 : vector<4x1xf32>
    %9 = arith.addf %3, %8 : vector<4x1xf32>
    %10 = arith.index_cast %arg0 : i32 to index
    %c1 = arith.constant 1 : index
    %11 = memref.load %arg3[%10, %c1] : memref<2x4xf32, #tpu.memory_space<smem>>
    %12 = vector.extract_strided_slice %2 {offsets = [0, 1], sizes = [4, 1], strides = [1, 1]} : vector<4x4xf32> to vector<4x1xf32>
    %13 = vector.broadcast %11 : f32 to vector<4x1xf32>
    %14 = arith.mulf %13, %12 : vector<4x1xf32>
    %15 = arith.addf %9, %14 : vector<4x1xf32>
    %16 = arith.index_cast %arg0 : i32 to index
    %c2 = arith.constant 2 : index
    %17 = memref.load %arg3[%16, %c2] : memref<2x4xf32, #tpu.memory_space<smem>>
    %18 = vector.extract_strided_slice %2 {offsets = [0, 2], sizes = [4, 1], strides = [1, 1]} : vector<4x4xf32> to vector<4x1xf32>
    %19 = vector.broadcast %17 : f32 to vector<4x1xf32>
    %20 = arith.mulf %19, %18 : vector<4x1xf32>
    %21 = arith.addf %15, %20 : vector<4x1xf32>
    %22 = arith.index_cast %arg0 : i32 to index
    %c3 = arith.constant 3 : index
    %23 = memref.load %arg3[%22, %c3] : memref<2x4xf32, #tpu.memory_space<smem>>
    %24 = vector.extract_strided_slice %2 {offsets = [0, 3], sizes = [4, 1], strides = [1, 1]} : vector<4x4xf32> to vector<4x1xf32>
    %25 = vector.broadcast %23 : f32 to vector<4x1xf32>
    %26 = arith.mulf %25, %24 : vector<4x1xf32>
    %27 = arith.addf %21, %26 : vector<4x1xf32>
    %cst = arith.constant dense<0.000000e+00> : vector<1xf32>
    %28 = vector.multi_reduction <add>, %27, %cst [0] : vector<4x1xf32> to vector<1xf32>
    %29 = vector.shape_cast %28 : vector<1xf32> to vector<1x1xf32>
    %cst_7 = arith.constant 4.000000e+00 : f32
    %30 = vector.broadcast %cst_7 : f32 to vector<1x1xf32>
    %31 = arith.divf %29, %30 : vector<1x1xf32>
    %32 = vector.broadcast %31 : vector<1x1xf32> to vector<4x1xf32>
    %33 = arith.subf %27, %32 : vector<4x1xf32>
    %34 = arith.mulf %33, %33 : vector<4x1xf32>
    %cst_8 = arith.constant dense<0.000000e+00> : vector<1xf32>
    %35 = vector.multi_reduction <add>, %34, %cst_8 [0] : vector<4x1xf32> to vector<1xf32>
    %36 = vector.shape_cast %35 : vector<1xf32> to vector<1x1xf32>
    %cst_9 = arith.constant 4.000000e+00 : f32
    %37 = vector.broadcast %cst_9 : f32 to vector<1x1xf32>
    %38 = arith.divf %36, %37 : vector<1x1xf32>
    %39 = vector.broadcast %31 : vector<1x1xf32> to vector<4x1xf32>
    %40 = arith.subf %27, %39 : vector<4x1xf32>
    %cst_10 = arith.constant 9.99999974E-6 : f32
    %41 = vector.broadcast %cst_10 : f32 to vector<1x1xf32>
    %42 = arith.addf %38, %41 : vector<1x1xf32>
    %43 = math.rsqrt %42 : vector<1x1xf32>
    %44 = vector.broadcast %43 : vector<1x1xf32> to vector<4x1xf32>
    %45 = arith.mulf %40, %44 : vector<4x1xf32>
    %c0_11 = arith.constant 0 : index
    %c0_12 = arith.constant 0 : index
    %46 = vector.load %arg6[%c0_11, %c0_12] : memref<4x1xf32, #tpu.memory_space<vmem>>, vector<4x1xf32>
    %47 = arith.mulf %45, %46 : vector<4x1xf32>
    %c0_13 = arith.constant 0 : index
    %c0_14 = arith.constant 0 : index
    %48 = vector.load %arg7[%c0_13, %c0_14] : memref<4x1xf32, #tpu.memory_space<vmem>>, vector<4x1xf32>
    %49 = arith.addf %47, %48 : vector<4x1xf32>
    %50 = vector.broadcast %49 : vector<4x1xf32> to vector<4x256xf32>
    %51 = arith.mulf %1, %50 : vector<4x256xf32>
    %cst_15 = arith.constant dense<0.000000e+00> : vector<256xf32>
    %52 = vector.multi_reduction <add>, %51, %cst_15 [0] : vector<4x256xf32> to vector<256xf32>
    %53 = vector.shape_cast %52 : vector<256xf32> to vector<1x256xf32>
    %c0_16 = arith.constant 0 : index
    %c0_17 = arith.constant 0 : index
    %54 = vector.load %arg8[%c0_16, %c0_17] : memref<1x256xf32, #tpu.memory_space<vmem>>, vector<1x256xf32>
    %c0_18 = arith.constant 0 : index
    %c0_19 = arith.constant 0 : index
    %55 = vector.load %arg9[%c0_18, %c0_19] : memref<1x256xf32, #tpu.memory_space<vmem>>, vector<1x256xf32>
    %56 = arith.index_cast %arg0 : i32 to index
    %c1_20 = arith.constant 1 : index
    %57 = memref.load %arg1[%56, %c1_20] : memref<2x2xi32, #tpu.memory_space<smem>>
    %58 = arith.sitofp %57 : i32 to f32
    %59 = arith.index_cast %arg0 : i32 to index
    %c0_21 = arith.constant 0 : index
    %60 = memref.load %arg1[%59, %c0_21] : memref<2x2xi32, #tpu.memory_space<smem>>
    %61 = arith.sitofp %60 : i32 to f32
    %62 = vector.broadcast %58 : f32 to vector<1x256xf32>
    %63 = arith.subf %62, %54 : vector<1x256xf32>
    %cst_22 = arith.constant 3.125000e-02 : f32
    %64 = vector.broadcast %cst_22 : f32 to vector<1x256xf32>
    %65 = arith.mulf %63, %64 : vector<1x256xf32>
    %66 = vector.broadcast %61 : f32 to vector<1x256xf32>
    %67 = arith.subf %66, %55 : vector<1x256xf32>
    %cst_23 = arith.constant 3.125000e-02 : f32
    %68 = vector.broadcast %cst_23 : f32 to vector<1x256xf32>
    %69 = arith.mulf %67, %68 : vector<1x256xf32>
    %70 = tpu.concatenate %53, %65, %69 in 0 : vector<1x256xf32>, vector<1x256xf32>, vector<1x256xf32> -> vector<3x256xf32>
    %cst_24 = arith.constant 2.000000e+00 : f32
    %71 = vector.broadcast %cst_24 : f32 to vector<1x256xf32>
    %72 = arith.cmpf oge, %54, %71 : vector<1x256xf32>
    %cst_25 = arith.constant 2.000000e+00 : f32
    %73 = vector.broadcast %cst_25 : f32 to vector<1x256xf32>
    %74 = arith.cmpf oge, %55, %73 : vector<1x256xf32>
    %cst_26 = arith.constant 1.000000e+00 : f32
    %75 = vector.broadcast %cst_26 : f32 to vector<1x256xf32>
    %76 = arith.cmpf oge, %54, %75 : vector<1x256xf32>
    %cst_27 = arith.constant 1.000000e+00 : f32
    %77 = vector.broadcast %cst_27 : f32 to vector<1x256xf32>
    %78 = arith.cmpf oge, %55, %77 : vector<1x256xf32>
    %cst_28 = arith.constant 1.500000e+01 : f32
    %79 = vector.broadcast %cst_28 : f32 to vector<1x256xf32>
    %80 = arith.cmpf olt, %54, %79 : vector<1x256xf32>
    %cst_29 = arith.constant 1.500000e+01 : f32
    %81 = vector.broadcast %cst_29 : f32 to vector<1x256xf32>
    %82 = arith.cmpf olt, %55, %81 : vector<1x256xf32>
    %cst_30 = arith.constant 1.400000e+01 : f32
    %83 = vector.broadcast %cst_30 : f32 to vector<1x256xf32>
    %84 = arith.cmpf olt, %54, %83 : vector<1x256xf32>
    %cst_31 = arith.constant 1.400000e+01 : f32
    %85 = vector.broadcast %cst_31 : f32 to vector<1x256xf32>
    %86 = arith.cmpf olt, %55, %85 : vector<1x256xf32>
    %cst_32 = arith.constant 0.000000e+00 : f32
    %87 = vector.broadcast %cst_32 : f32 to vector<1x256xf32>
    %c0_33 = arith.constant 0 : index
    %88 = memref.load %arg11[%c0_33] : memref<1xf32, #tpu.memory_space<smem>>
    %89 = vector.broadcast %88 : f32 to vector<1x256xf32>
    %90 = arith.addf %87, %89 : vector<1x256xf32>
    %c34_i32 = arith.constant 34 : i32
    %91 = tpu.dynamic_rotate %70 by %c34_i32 dim 1 : vector<3x256xf32>, i32 -> vector<3x256xf32>
    %92 = arith.andi %74, %72 : vector<1x256xi1>
    %cst_34 = arith.constant 0.000000e+00 : f32
    %93 = vector.shape_cast %92 : vector<1x256xi1> to vector<1x256xi1>
    %94 = vector.broadcast %93 : vector<1x256xi1> to vector<3x256xi1>
    %95 = vector.broadcast %cst_34 : f32 to vector<3x256xf32>
    %96 = arith.select %94, %91, %95 : vector<3x256xi1>, vector<3x256xf32>
    %c0_35 = arith.constant 0 : index
    %c0_36 = arith.constant 0 : index
    %97 = memref.load %arg10[%c0_35, %c0_36] : memref<3x25xf32, #tpu.memory_space<smem>>
    %98 = vector.extract_strided_slice %96 {offsets = [0, 0], sizes = [1, 256], strides = [1, 1]} : vector<3x256xf32> to vector<1x256xf32>
    %99 = vector.broadcast %97 : f32 to vector<1x256xf32>
    %100 = arith.mulf %99, %98 : vector<1x256xf32>
    %101 = arith.addf %90, %100 : vector<1x256xf32>
    %c1_37 = arith.constant 1 : index
    %c0_38 = arith.constant 0 : index
    %102 = memref.load %arg10[%c1_37, %c0_38] : memref<3x25xf32, #tpu.memory_space<smem>>
    %103 = vector.extract_strided_slice %96 {offsets = [1, 0], sizes = [1, 256], strides = [1, 1]} : vector<3x256xf32> to vector<1x256xf32>
    %104 = vector.broadcast %102 : f32 to vector<1x256xf32>
    %105 = arith.mulf %104, %103 : vector<1x256xf32>
    %106 = arith.addf %101, %105 : vector<1x256xf32>
    %c2_39 = arith.constant 2 : index
    %c0_40 = arith.constant 0 : index
    %107 = memref.load %arg10[%c2_39, %c0_40] : memref<3x25xf32, #tpu.memory_space<smem>>
    %108 = vector.extract_strided_slice %96 {offsets = [2, 0], sizes = [1, 256], strides = [1, 1]} : vector<3x256xf32> to vector<1x256xf32>
    %109 = vector.broadcast %107 : f32 to vector<1x256xf32>
    %110 = arith.mulf %109, %108 : vector<1x256xf32>
    %111 = arith.addf %106, %110 : vector<1x256xf32>
    %c33_i32 = arith.constant 33 : i32
    %112 = tpu.dynamic_rotate %70 by %c33_i32 dim 1 : vector<3x256xf32>, i32 -> vector<3x256xf32>
    %113 = arith.andi %74, %76 : vector<1x256xi1>
    %cst_41 = arith.constant 0.000000e+00 : f32
    %114 = vector.shape_cast %113 : vector<1x256xi1> to vector<1x256xi1>
    %115 = vector.broadcast %114 : vector<1x256xi1> to vector<3x256xi1>
    %116 = vector.broadcast %cst_41 : f32 to vector<3x256xf32>
    %117 = arith.select %115, %112, %116 : vector<3x256xi1>, vector<3x256xf32>
    %c0_42 = arith.constant 0 : index
    %c1_43 = arith.constant 1 : index
    %118 = memref.load %arg10[%c0_42, %c1_43] : memref<3x25xf32, #tpu.memory_space<smem>>
    %119 = vector.extract_strided_slice %117 {offsets = [0, 0], sizes = [1, 256], strides = [1, 1]} : vector<3x256xf32> to vector<1x256xf32>
    %120 = vector.broadcast %118 : f32 to vector<1x256xf32>
    %121 = arith.mulf %120, %119 : vector<1x256xf32>
    %122 = arith.addf %111, %121 : vector<1x256xf32>
    %c1_44 = arith.constant 1 : index
    %c1_45 = arith.constant 1 : index
    %123 = memref.load %arg10[%c1_44, %c1_45] : memref<3x25xf32, #tpu.memory_space<smem>>
    %124 = vector.extract_strided_slice %117 {offsets = [1, 0], sizes = [1, 256], strides = [1, 1]} : vector<3x256xf32> to vector<1x256xf32>
    %125 = vector.broadcast %123 : f32 to vector<1x256xf32>
    %126 = arith.mulf %125, %124 : vector<1x256xf32>
    %127 = arith.addf %122, %126 : vector<1x256xf32>
    %c2_46 = arith.constant 2 : index
    %c1_47 = arith.constant 1 : index
    %128 = memref.load %arg10[%c2_46, %c1_47] : memref<3x25xf32, #tpu.memory_space<smem>>
    %129 = vector.extract_strided_slice %117 {offsets = [2, 0], sizes = [1, 256], strides = [1, 1]} : vector<3x256xf32> to vector<1x256xf32>
    %130 = vector.broadcast %128 : f32 to vector<1x256xf32>
    %131 = arith.mulf %130, %129 : vector<1x256xf32>
    %132 = arith.addf %127, %131 : vector<1x256xf32>
    %c32_i32 = arith.constant 32 : i32
    %133 = tpu.dynamic_rotate %70 by %c32_i32 dim 1 : vector<3x256xf32>, i32 -> vector<3x256xf32>
    %cst_48 = arith.constant 0.000000e+00 : f32
    %134 = vector.shape_cast %74 : vector<1x256xi1> to vector<1x256xi1>
    %135 = vector.broadcast %134 : vector<1x256xi1> to vector<3x256xi1>
    %136 = vector.broadcast %cst_48 : f32 to vector<3x256xf32>
    %137 = arith.select %135, %133, %136 : vector<3x256xi1>, vector<3x256xf32>
    %c0_49 = arith.constant 0 : index
    %c2_50 = arith.constant 2 : index
    %138 = memref.load %arg10[%c0_49, %c2_50] : memref<3x25xf32, #tpu.memory_space<smem>>
    %139 = vector.extract_strided_slice %137 {offsets = [0, 0], sizes = [1, 256], strides = [1, 1]} : vector<3x256xf32> to vector<1x256xf32>
    %140 = vector.broadcast %138 : f32 to vector<1x256xf32>
    %141 = arith.mulf %140, %139 : vector<1x256xf32>
    %142 = arith.addf %132, %141 : vector<1x256xf32>
    %c1_51 = arith.constant 1 : index
    %c2_52 = arith.constant 2 : index
    %143 = memref.load %arg10[%c1_51, %c2_52] : memref<3x25xf32, #tpu.memory_space<smem>>
    %144 = vector.extract_strided_slice %137 {offsets = [1, 0], sizes = [1, 256], strides = [1, 1]} : vector<3x256xf32> to vector<1x256xf32>
    %145 = vector.broadcast %143 : f32 to vector<1x256xf32>
    %146 = arith.mulf %145, %144 : vector<1x256xf32>
    %147 = arith.addf %142, %146 : vector<1x256xf32>
    %c2_53 = arith.constant 2 : index
    %c2_54 = arith.constant 2 : index
    %148 = memref.load %arg10[%c2_53, %c2_54] : memref<3x25xf32, #tpu.memory_space<smem>>
    %149 = vector.extract_strided_slice %137 {offsets = [2, 0], sizes = [1, 256], strides = [1, 1]} : vector<3x256xf32> to vector<1x256xf32>
    %150 = vector.broadcast %148 : f32 to vector<1x256xf32>
    %151 = arith.mulf %150, %149 : vector<1x256xf32>
    %152 = arith.addf %147, %151 : vector<1x256xf32>
    %c31_i32 = arith.constant 31 : i32
    %153 = tpu.dynamic_rotate %70 by %c31_i32 dim 1 : vector<3x256xf32>, i32 -> vector<3x256xf32>
    %154 = arith.andi %74, %80 : vector<1x256xi1>
    %cst_55 = arith.constant 0.000000e+00 : f32
    %155 = vector.shape_cast %154 : vector<1x256xi1> to vector<1x256xi1>
    %156 = vector.broadcast %155 : vector<1x256xi1> to vector<3x256xi1>
    %157 = vector.broadcast %cst_55 : f32 to vector<3x256xf32>
    %158 = arith.select %156, %153, %157 : vector<3x256xi1>, vector<3x256xf32>
    %c0_56 = arith.constant 0 : index
    %c3_57 = arith.constant 3 : index
    %159 = memref.load %arg10[%c0_56, %c3_57] : memref<3x25xf32, #tpu.memory_space<smem>>
    %160 = vector.extract_strided_slice %158 {offsets = [0, 0], sizes = [1, 256], strides = [1, 1]} : vector<3x256xf32> to vector<1x256xf32>
    %161 = vector.broadcast %159 : f32 to vector<1x256xf32>
    %162 = arith.mulf %161, %160 : vector<1x256xf32>
    %163 = arith.addf %152, %162 : vector<1x256xf32>
    %c1_58 = arith.constant 1 : index
    %c3_59 = arith.constant 3 : index
    %164 = memref.load %arg10[%c1_58, %c3_59] : memref<3x25xf32, #tpu.memory_space<smem>>
    %165 = vector.extract_strided_slice %158 {offsets = [1, 0], sizes = [1, 256], strides = [1, 1]} : vector<3x256xf32> to vector<1x256xf32>
    %166 = vector.broadcast %164 : f32 to vector<1x256xf32>
    %167 = arith.mulf %166, %165 : vector<1x256xf32>
    %168 = arith.addf %163, %167 : vector<1x256xf32>
    %c2_60 = arith.constant 2 : index
    %c3_61 = arith.constant 3 : index
    %169 = memref.load %arg10[%c2_60, %c3_61] : memref<3x25xf32, #tpu.memory_space<smem>>
    %170 = vector.extract_strided_slice %158 {offsets = [2, 0], sizes = [1, 256], strides = [1, 1]} : vector<3x256xf32> to vector<1x256xf32>
    %171 = vector.broadcast %169 : f32 to vector<1x256xf32>
    %172 = arith.mulf %171, %170 : vector<1x256xf32>
    %173 = arith.addf %168, %172 : vector<1x256xf32>
    %c30_i32 = arith.constant 30 : i32
    %174 = tpu.dynamic_rotate %70 by %c30_i32 dim 1 : vector<3x256xf32>, i32 -> vector<3x256xf32>
    %175 = arith.andi %74, %84 : vector<1x256xi1>
    %cst_62 = arith.constant 0.000000e+00 : f32
    %176 = vector.shape_cast %175 : vector<1x256xi1> to vector<1x256xi1>
    %177 = vector.broadcast %176 : vector<1x256xi1> to vector<3x256xi1>
    %178 = vector.broadcast %cst_62 : f32 to vector<3x256xf32>
    %179 = arith.select %177, %174, %178 : vector<3x256xi1>, vector<3x256xf32>
    %c0_63 = arith.constant 0 : index
    %c4 = arith.constant 4 : index
    %180 = memref.load %arg10[%c0_63, %c4] : memref<3x25xf32, #tpu.memory_space<smem>>
    %181 = vector.extract_strided_slice %179 {offsets = [0, 0], sizes = [1, 256], strides = [1, 1]} : vector<3x256xf32> to vector<1x256xf32>
    %182 = vector.broadcast %180 : f32 to vector<1x256xf32>
    %183 = arith.mulf %182, %181 : vector<1x256xf32>
    %184 = arith.addf %173, %183 : vector<1x256xf32>
    %c1_64 = arith.constant 1 : index
    %c4_65 = arith.constant 4 : index
    %185 = memref.load %arg10[%c1_64, %c4_65] : memref<3x25xf32, #tpu.memory_space<smem>>
    %186 = vector.extract_strided_slice %179 {offsets = [1, 0], sizes = [1, 256], strides = [1, 1]} : vector<3x256xf32> to vector<1x256xf32>
    %187 = vector.broadcast %185 : f32 to vector<1x256xf32>
    %188 = arith.mulf %187, %186 : vector<1x256xf32>
    %189 = arith.addf %184, %188 : vector<1x256xf32>
    %c2_66 = arith.constant 2 : index
    %c4_67 = arith.constant 4 : index
    %190 = memref.load %arg10[%c2_66, %c4_67] : memref<3x25xf32, #tpu.memory_space<smem>>
    %191 = vector.extract_strided_slice %179 {offsets = [2, 0], sizes = [1, 256], strides = [1, 1]} : vector<3x256xf32> to vector<1x256xf32>
    %192 = vector.broadcast %190 : f32 to vector<1x256xf32>
    %193 = arith.mulf %192, %191 : vector<1x256xf32>
    %194 = arith.addf %189, %193 : vector<1x256xf32>
    %c18_i32 = arith.constant 18 : i32
    %195 = tpu.dynamic_rotate %70 by %c18_i32 dim 1 : vector<3x256xf32>, i32 -> vector<3x256xf32>
    %196 = arith.andi %78, %72 : vector<1x256xi1>
    %cst_68 = arith.constant 0.000000e+00 : f32
    %197 = vector.shape_cast %196 : vector<1x256xi1> to vector<1x256xi1>
    %198 = vector.broadcast %197 : vector<1x256xi1> to vector<3x256xi1>
    %199 = vector.broadcast %cst_68 : f32 to vector<3x256xf32>
    %200 = arith.select %198, %195, %199 : vector<3x256xi1>, vector<3x256xf32>
    %c0_69 = arith.constant 0 : index
    %c5 = arith.constant 5 : index
    %201 = memref.load %arg10[%c0_69, %c5] : memref<3x25xf32, #tpu.memory_space<smem>>
    %202 = vector.extract_strided_slice %200 {offsets = [0, 0], sizes = [1, 256], strides = [1, 1]} : vector<3x256xf32> to vector<1x256xf32>
    %203 = vector.broadcast %201 : f32 to vector<1x256xf32>
    %204 = arith.mulf %203, %202 : vector<1x256xf32>
    %205 = arith.addf %194, %204 : vector<1x256xf32>
    %c1_70 = arith.constant 1 : index
    %c5_71 = arith.constant 5 : index
    %206 = memref.load %arg10[%c1_70, %c5_71] : memref<3x25xf32, #tpu.memory_space<smem>>
    %207 = vector.extract_strided_slice %200 {offsets = [1, 0], sizes = [1, 256], strides = [1, 1]} : vector<3x256xf32> to vector<1x256xf32>
    %208 = vector.broadcast %206 : f32 to vector<1x256xf32>
    %209 = arith.mulf %208, %207 : vector<1x256xf32>
    %210 = arith.addf %205, %209 : vector<1x256xf32>
    %c2_72 = arith.constant 2 : index
    %c5_73 = arith.constant 5 : index
    %211 = memref.load %arg10[%c2_72, %c5_73] : memref<3x25xf32, #tpu.memory_space<smem>>
    %212 = vector.extract_strided_slice %200 {offsets = [2, 0], sizes = [1, 256], strides = [1, 1]} : vector<3x256xf32> to vector<1x256xf32>
    %213 = vector.broadcast %211 : f32 to vector<1x256xf32>
    %214 = arith.mulf %213, %212 : vector<1x256xf32>
    %215 = arith.addf %210, %214 : vector<1x256xf32>
    %c17_i32 = arith.constant 17 : i32
    %216 = tpu.dynamic_rotate %70 by %c17_i32 dim 1 : vector<3x256xf32>, i32 -> vector<3x256xf32>
    %217 = arith.andi %78, %76 : vector<1x256xi1>
    %cst_74 = arith.constant 0.000000e+00 : f32
    %218 = vector.shape_cast %217 : vector<1x256xi1> to vector<1x256xi1>
    %219 = vector.broadcast %218 : vector<1x256xi1> to vector<3x256xi1>
    %220 = vector.broadcast %cst_74 : f32 to vector<3x256xf32>
    %221 = arith.select %219, %216, %220 : vector<3x256xi1>, vector<3x256xf32>
    %c0_75 = arith.constant 0 : index
    %c6 = arith.constant 6 : index
    %222 = memref.load %arg10[%c0_75, %c6] : memref<3x25xf32, #tpu.memory_space<smem>>
    %223 = vector.extract_strided_slice %221 {offsets = [0, 0], sizes = [1, 256], strides = [1, 1]} : vector<3x256xf32> to vector<1x256xf32>
    %224 = vector.broadcast %222 : f32 to vector<1x256xf32>
    %225 = arith.mulf %224, %223 : vector<1x256xf32>
    %226 = arith.addf %215, %225 : vector<1x256xf32>
    %c1_76 = arith.constant 1 : index
    %c6_77 = arith.constant 6 : index
    %227 = memref.load %arg10[%c1_76, %c6_77] : memref<3x25xf32, #tpu.memory_space<smem>>
    %228 = vector.extract_strided_slice %221 {offsets = [1, 0], sizes = [1, 256], strides = [1, 1]} : vector<3x256xf32> to vector<1x256xf32>
    %229 = vector.broadcast %227 : f32 to vector<1x256xf32>
    %230 = arith.mulf %229, %228 : vector<1x256xf32>
    %231 = arith.addf %226, %230 : vector<1x256xf32>
    %c2_78 = arith.constant 2 : index
    %c6_79 = arith.constant 6 : index
    %232 = memref.load %arg10[%c2_78, %c6_79] : memref<3x25xf32, #tpu.memory_space<smem>>
    %233 = vector.extract_strided_slice %221 {offsets = [2, 0], sizes = [1, 256], strides = [1, 1]} : vector<3x256xf32> to vector<1x256xf32>
    %234 = vector.broadcast %232 : f32 to vector<1x256xf32>
    %235 = arith.mulf %234, %233 : vector<1x256xf32>
    %236 = arith.addf %231, %235 : vector<1x256xf32>
    %c16_i32 = arith.constant 16 : i32
    %237 = tpu.dynamic_rotate %70 by %c16_i32 dim 1 : vector<3x256xf32>, i32 -> vector<3x256xf32>
    %cst_80 = arith.constant 0.000000e+00 : f32
    %238 = vector.shape_cast %78 : vector<1x256xi1> to vector<1x256xi1>
    %239 = vector.broadcast %238 : vector<1x256xi1> to vector<3x256xi1>
    %240 = vector.broadcast %cst_80 : f32 to vector<3x256xf32>
    %241 = arith.select %239, %237, %240 : vector<3x256xi1>, vector<3x256xf32>
    %c0_81 = arith.constant 0 : index
    %c7 = arith.constant 7 : index
    %242 = memref.load %arg10[%c0_81, %c7] : memref<3x25xf32, #tpu.memory_space<smem>>
    %243 = vector.extract_strided_slice %241 {offsets = [0, 0], sizes = [1, 256], strides = [1, 1]} : vector<3x256xf32> to vector<1x256xf32>
    %244 = vector.broadcast %242 : f32 to vector<1x256xf32>
    %245 = arith.mulf %244, %243 : vector<1x256xf32>
    %246 = arith.addf %236, %245 : vector<1x256xf32>
    %c1_82 = arith.constant 1 : index
    %c7_83 = arith.constant 7 : index
    %247 = memref.load %arg10[%c1_82, %c7_83] : memref<3x25xf32, #tpu.memory_space<smem>>
    %248 = vector.extract_strided_slice %241 {offsets = [1, 0], sizes = [1, 256], strides = [1, 1]} : vector<3x256xf32> to vector<1x256xf32>
    %249 = vector.broadcast %247 : f32 to vector<1x256xf32>
    %250 = arith.mulf %249, %248 : vector<1x256xf32>
    %251 = arith.addf %246, %250 : vector<1x256xf32>
    %c2_84 = arith.constant 2 : index
    %c7_85 = arith.constant 7 : index
    %252 = memref.load %arg10[%c2_84, %c7_85] : memref<3x25xf32, #tpu.memory_space<smem>>
    %253 = vector.extract_strided_slice %241 {offsets = [2, 0], sizes = [1, 256], strides = [1, 1]} : vector<3x256xf32> to vector<1x256xf32>
    %254 = vector.broadcast %252 : f32 to vector<1x256xf32>
    %255 = arith.mulf %254, %253 : vector<1x256xf32>
    %256 = arith.addf %251, %255 : vector<1x256xf32>
    %c15_i32 = arith.constant 15 : i32
    %257 = tpu.dynamic_rotate %70 by %c15_i32 dim 1 : vector<3x256xf32>, i32 -> vector<3x256xf32>
    %258 = arith.andi %78, %80 : vector<1x256xi1>
    %cst_86 = arith.constant 0.000000e+00 : f32
    %259 = vector.shape_cast %258 : vector<1x256xi1> to vector<1x256xi1>
    %260 = vector.broadcast %259 : vector<1x256xi1> to vector<3x256xi1>
    %261 = vector.broadcast %cst_86 : f32 to vector<3x256xf32>
    %262 = arith.select %260, %257, %261 : vector<3x256xi1>, vector<3x256xf32>
    %c0_87 = arith.constant 0 : index
    %c8 = arith.constant 8 : index
    %263 = memref.load %arg10[%c0_87, %c8] : memref<3x25xf32, #tpu.memory_space<smem>>
    %264 = vector.extract_strided_slice %262 {offsets = [0, 0], sizes = [1, 256], strides = [1, 1]} : vector<3x256xf32> to vector<1x256xf32>
    %265 = vector.broadcast %263 : f32 to vector<1x256xf32>
    %266 = arith.mulf %265, %264 : vector<1x256xf32>
    %267 = arith.addf %256, %266 : vector<1x256xf32>
    %c1_88 = arith.constant 1 : index
    %c8_89 = arith.constant 8 : index
    %268 = memref.load %arg10[%c1_88, %c8_89] : memref<3x25xf32, #tpu.memory_space<smem>>
    %269 = vector.extract_strided_slice %262 {offsets = [1, 0], sizes = [1, 256], strides = [1, 1]} : vector<3x256xf32> to vector<1x256xf32>
    %270 = vector.broadcast %268 : f32 to vector<1x256xf32>
    %271 = arith.mulf %270, %269 : vector<1x256xf32>
    %272 = arith.addf %267, %271 : vector<1x256xf32>
    %c2_90 = arith.constant 2 : index
    %c8_91 = arith.constant 8 : index
    %273 = memref.load %arg10[%c2_90, %c8_91] : memref<3x25xf32, #tpu.memory_space<smem>>
    %274 = vector.extract_strided_slice %262 {offsets = [2, 0], sizes = [1, 256], strides = [1, 1]} : vector<3x256xf32> to vector<1x256xf32>
    %275 = vector.broadcast %273 : f32 to vector<1x256xf32>
    %276 = arith.mulf %275, %274 : vector<1x256xf32>
    %277 = arith.addf %272, %276 : vector<1x256xf32>
    %c14_i32 = arith.constant 14 : i32
    %278 = tpu.dynamic_rotate %70 by %c14_i32 dim 1 : vector<3x256xf32>, i32 -> vector<3x256xf32>
    %279 = arith.andi %78, %84 : vector<1x256xi1>
    %cst_92 = arith.constant 0.000000e+00 : f32
    %280 = vector.shape_cast %279 : vector<1x256xi1> to vector<1x256xi1>
    %281 = vector.broadcast %280 : vector<1x256xi1> to vector<3x256xi1>
    %282 = vector.broadcast %cst_92 : f32 to vector<3x256xf32>
    %283 = arith.select %281, %278, %282 : vector<3x256xi1>, vector<3x256xf32>
    %c0_93 = arith.constant 0 : index
    %c9 = arith.constant 9 : index
    %284 = memref.load %arg10[%c0_93, %c9] : memref<3x25xf32, #tpu.memory_space<smem>>
    %285 = vector.extract_strided_slice %283 {offsets = [0, 0], sizes = [1, 256], strides = [1, 1]} : vector<3x256xf32> to vector<1x256xf32>
    %286 = vector.broadcast %284 : f32 to vector<1x256xf32>
    %287 = arith.mulf %286, %285 : vector<1x256xf32>
    %288 = arith.addf %277, %287 : vector<1x256xf32>
    %c1_94 = arith.constant 1 : index
    %c9_95 = arith.constant 9 : index
    %289 = memref.load %arg10[%c1_94, %c9_95] : memref<3x25xf32, #tpu.memory_space<smem>>
    %290 = vector.extract_strided_slice %283 {offsets = [1, 0], sizes = [1, 256], strides = [1, 1]} : vector<3x256xf32> to vector<1x256xf32>
    %291 = vector.broadcast %289 : f32 to vector<1x256xf32>
    %292 = arith.mulf %291, %290 : vector<1x256xf32>
    %293 = arith.addf %288, %292 : vector<1x256xf32>
    %c2_96 = arith.constant 2 : index
    %c9_97 = arith.constant 9 : index
    %294 = memref.load %arg10[%c2_96, %c9_97] : memref<3x25xf32, #tpu.memory_space<smem>>
    %295 = vector.extract_strided_slice %283 {offsets = [2, 0], sizes = [1, 256], strides = [1, 1]} : vector<3x256xf32> to vector<1x256xf32>
    %296 = vector.broadcast %294 : f32 to vector<1x256xf32>
    %297 = arith.mulf %296, %295 : vector<1x256xf32>
    %298 = arith.addf %293, %297 : vector<1x256xf32>
    %c2_i32 = arith.constant 2 : i32
    %299 = tpu.dynamic_rotate %70 by %c2_i32 dim 1 : vector<3x256xf32>, i32 -> vector<3x256xf32>
    %cst_98 = arith.constant 0.000000e+00 : f32
    %300 = vector.shape_cast %72 : vector<1x256xi1> to vector<1x256xi1>
    %301 = vector.broadcast %300 : vector<1x256xi1> to vector<3x256xi1>
    %302 = vector.broadcast %cst_98 : f32 to vector<3x256xf32>
    %303 = arith.select %301, %299, %302 : vector<3x256xi1>, vector<3x256xf32>
    %c0_99 = arith.constant 0 : index
    %c10 = arith.constant 10 : index
    %304 = memref.load %arg10[%c0_99, %c10] : memref<3x25xf32, #tpu.memory_space<smem>>
    %305 = vector.extract_strided_slice %303 {offsets = [0, 0], sizes = [1, 256], strides = [1, 1]} : vector<3x256xf32> to vector<1x256xf32>
    %306 = vector.broadcast %304 : f32 to vector<1x256xf32>
    %307 = arith.mulf %306, %305 : vector<1x256xf32>
    %308 = arith.addf %298, %307 : vector<1x256xf32>
    %c1_100 = arith.constant 1 : index
    %c10_101 = arith.constant 10 : index
    %309 = memref.load %arg10[%c1_100, %c10_101] : memref<3x25xf32, #tpu.memory_space<smem>>
    %310 = vector.extract_strided_slice %303 {offsets = [1, 0], sizes = [1, 256], strides = [1, 1]} : vector<3x256xf32> to vector<1x256xf32>
    %311 = vector.broadcast %309 : f32 to vector<1x256xf32>
    %312 = arith.mulf %311, %310 : vector<1x256xf32>
    %313 = arith.addf %308, %312 : vector<1x256xf32>
    %c2_102 = arith.constant 2 : index
    %c10_103 = arith.constant 10 : index
    %314 = memref.load %arg10[%c2_102, %c10_103] : memref<3x25xf32, #tpu.memory_space<smem>>
    %315 = vector.extract_strided_slice %303 {offsets = [2, 0], sizes = [1, 256], strides = [1, 1]} : vector<3x256xf32> to vector<1x256xf32>
    %316 = vector.broadcast %314 : f32 to vector<1x256xf32>
    %317 = arith.mulf %316, %315 : vector<1x256xf32>
    %318 = arith.addf %313, %317 : vector<1x256xf32>
    %c1_i32 = arith.constant 1 : i32
    %319 = tpu.dynamic_rotate %70 by %c1_i32 dim 1 : vector<3x256xf32>, i32 -> vector<3x256xf32>
    %cst_104 = arith.constant 0.000000e+00 : f32
    %320 = vector.shape_cast %76 : vector<1x256xi1> to vector<1x256xi1>
    %321 = vector.broadcast %320 : vector<1x256xi1> to vector<3x256xi1>
    %322 = vector.broadcast %cst_104 : f32 to vector<3x256xf32>
    %323 = arith.select %321, %319, %322 : vector<3x256xi1>, vector<3x256xf32>
    %c0_105 = arith.constant 0 : index
    %c11 = arith.constant 11 : index
    %324 = memref.load %arg10[%c0_105, %c11] : memref<3x25xf32, #tpu.memory_space<smem>>
    %325 = vector.extract_strided_slice %323 {offsets = [0, 0], sizes = [1, 256], strides = [1, 1]} : vector<3x256xf32> to vector<1x256xf32>
    %326 = vector.broadcast %324 : f32 to vector<1x256xf32>
    %327 = arith.mulf %326, %325 : vector<1x256xf32>
    %328 = arith.addf %318, %327 : vector<1x256xf32>
    %c1_106 = arith.constant 1 : index
    %c11_107 = arith.constant 11 : index
    %329 = memref.load %arg10[%c1_106, %c11_107] : memref<3x25xf32, #tpu.memory_space<smem>>
    %330 = vector.extract_strided_slice %323 {offsets = [1, 0], sizes = [1, 256], strides = [1, 1]} : vector<3x256xf32> to vector<1x256xf32>
    %331 = vector.broadcast %329 : f32 to vector<1x256xf32>
    %332 = arith.mulf %331, %330 : vector<1x256xf32>
    %333 = arith.addf %328, %332 : vector<1x256xf32>
    %c2_108 = arith.constant 2 : index
    %c11_109 = arith.constant 11 : index
    %334 = memref.load %arg10[%c2_108, %c11_109] : memref<3x25xf32, #tpu.memory_space<smem>>
    %335 = vector.extract_strided_slice %323 {offsets = [2, 0], sizes = [1, 256], strides = [1, 1]} : vector<3x256xf32> to vector<1x256xf32>
    %336 = vector.broadcast %334 : f32 to vector<1x256xf32>
    %337 = arith.mulf %336, %335 : vector<1x256xf32>
    %338 = arith.addf %333, %337 : vector<1x256xf32>
    %c0_110 = arith.constant 0 : index
    %c12 = arith.constant 12 : index
    %339 = memref.load %arg10[%c0_110, %c12] : memref<3x25xf32, #tpu.memory_space<smem>>
    %340 = vector.extract_strided_slice %70 {offsets = [0, 0], sizes = [1, 256], strides = [1, 1]} : vector<3x256xf32> to vector<1x256xf32>
    %341 = vector.broadcast %339 : f32 to vector<1x256xf32>
    %342 = arith.mulf %341, %340 : vector<1x256xf32>
    %343 = arith.addf %338, %342 : vector<1x256xf32>
    %c1_111 = arith.constant 1 : index
    %c12_112 = arith.constant 12 : index
    %344 = memref.load %arg10[%c1_111, %c12_112] : memref<3x25xf32, #tpu.memory_space<smem>>
    %345 = vector.extract_strided_slice %70 {offsets = [1, 0], sizes = [1, 256], strides = [1, 1]} : vector<3x256xf32> to vector<1x256xf32>
    %346 = vector.broadcast %344 : f32 to vector<1x256xf32>
    %347 = arith.mulf %346, %345 : vector<1x256xf32>
    %348 = arith.addf %343, %347 : vector<1x256xf32>
    %c2_113 = arith.constant 2 : index
    %c12_114 = arith.constant 12 : index
    %349 = memref.load %arg10[%c2_113, %c12_114] : memref<3x25xf32, #tpu.memory_space<smem>>
    %350 = vector.extract_strided_slice %70 {offsets = [2, 0], sizes = [1, 256], strides = [1, 1]} : vector<3x256xf32> to vector<1x256xf32>
    %351 = vector.broadcast %349 : f32 to vector<1x256xf32>
    %352 = arith.mulf %351, %350 : vector<1x256xf32>
    %353 = arith.addf %348, %352 : vector<1x256xf32>
    %c255_i32 = arith.constant 255 : i32
    %354 = tpu.dynamic_rotate %70 by %c255_i32 dim 1 : vector<3x256xf32>, i32 -> vector<3x256xf32>
    %cst_115 = arith.constant 0.000000e+00 : f32
    %355 = vector.shape_cast %80 : vector<1x256xi1> to vector<1x256xi1>
    %356 = vector.broadcast %355 : vector<1x256xi1> to vector<3x256xi1>
    %357 = vector.broadcast %cst_115 : f32 to vector<3x256xf32>
    %358 = arith.select %356, %354, %357 : vector<3x256xi1>, vector<3x256xf32>
    %c0_116 = arith.constant 0 : index
    %c13 = arith.constant 13 : index
    %359 = memref.load %arg10[%c0_116, %c13] : memref<3x25xf32, #tpu.memory_space<smem>>
    %360 = vector.extract_strided_slice %358 {offsets = [0, 0], sizes = [1, 256], strides = [1, 1]} : vector<3x256xf32> to vector<1x256xf32>
    %361 = vector.broadcast %359 : f32 to vector<1x256xf32>
    %362 = arith.mulf %361, %360 : vector<1x256xf32>
    %363 = arith.addf %353, %362 : vector<1x256xf32>
    %c1_117 = arith.constant 1 : index
    %c13_118 = arith.constant 13 : index
    %364 = memref.load %arg10[%c1_117, %c13_118] : memref<3x25xf32, #tpu.memory_space<smem>>
    %365 = vector.extract_strided_slice %358 {offsets = [1, 0], sizes = [1, 256], strides = [1, 1]} : vector<3x256xf32> to vector<1x256xf32>
    %366 = vector.broadcast %364 : f32 to vector<1x256xf32>
    %367 = arith.mulf %366, %365 : vector<1x256xf32>
    %368 = arith.addf %363, %367 : vector<1x256xf32>
    %c2_119 = arith.constant 2 : index
    %c13_120 = arith.constant 13 : index
    %369 = memref.load %arg10[%c2_119, %c13_120] : memref<3x25xf32, #tpu.memory_space<smem>>
    %370 = vector.extract_strided_slice %358 {offsets = [2, 0], sizes = [1, 256], strides = [1, 1]} : vector<3x256xf32> to vector<1x256xf32>
    %371 = vector.broadcast %369 : f32 to vector<1x256xf32>
    %372 = arith.mulf %371, %370 : vector<1x256xf32>
    %373 = arith.addf %368, %372 : vector<1x256xf32>
    %c254_i32 = arith.constant 254 : i32
    %374 = tpu.dynamic_rotate %70 by %c254_i32 dim 1 : vector<3x256xf32>, i32 -> vector<3x256xf32>
    %cst_121 = arith.constant 0.000000e+00 : f32
    %375 = vector.shape_cast %84 : vector<1x256xi1> to vector<1x256xi1>
    %376 = vector.broadcast %375 : vector<1x256xi1> to vector<3x256xi1>
    %377 = vector.broadcast %cst_121 : f32 to vector<3x256xf32>
    %378 = arith.select %376, %374, %377 : vector<3x256xi1>, vector<3x256xf32>
    %c0_122 = arith.constant 0 : index
    %c14 = arith.constant 14 : index
    %379 = memref.load %arg10[%c0_122, %c14] : memref<3x25xf32, #tpu.memory_space<smem>>
    %380 = vector.extract_strided_slice %378 {offsets = [0, 0], sizes = [1, 256], strides = [1, 1]} : vector<3x256xf32> to vector<1x256xf32>
    %381 = vector.broadcast %379 : f32 to vector<1x256xf32>
    %382 = arith.mulf %381, %380 : vector<1x256xf32>
    %383 = arith.addf %373, %382 : vector<1x256xf32>
    %c1_123 = arith.constant 1 : index
    %c14_124 = arith.constant 14 : index
    %384 = memref.load %arg10[%c1_123, %c14_124] : memref<3x25xf32, #tpu.memory_space<smem>>
    %385 = vector.extract_strided_slice %378 {offsets = [1, 0], sizes = [1, 256], strides = [1, 1]} : vector<3x256xf32> to vector<1x256xf32>
    %386 = vector.broadcast %384 : f32 to vector<1x256xf32>
    %387 = arith.mulf %386, %385 : vector<1x256xf32>
    %388 = arith.addf %383, %387 : vector<1x256xf32>
    %c2_125 = arith.constant 2 : index
    %c14_126 = arith.constant 14 : index
    %389 = memref.load %arg10[%c2_125, %c14_126] : memref<3x25xf32, #tpu.memory_space<smem>>
    %390 = vector.extract_strided_slice %378 {offsets = [2, 0], sizes = [1, 256], strides = [1, 1]} : vector<3x256xf32> to vector<1x256xf32>
    %391 = vector.broadcast %389 : f32 to vector<1x256xf32>
    %392 = arith.mulf %391, %390 : vector<1x256xf32>
    %393 = arith.addf %388, %392 : vector<1x256xf32>
    %c242_i32 = arith.constant 242 : i32
    %394 = tpu.dynamic_rotate %70 by %c242_i32 dim 1 : vector<3x256xf32>, i32 -> vector<3x256xf32>
    %395 = arith.andi %82, %72 : vector<1x256xi1>
    %cst_127 = arith.constant 0.000000e+00 : f32
    %396 = vector.shape_cast %395 : vector<1x256xi1> to vector<1x256xi1>
    %397 = vector.broadcast %396 : vector<1x256xi1> to vector<3x256xi1>
    %398 = vector.broadcast %cst_127 : f32 to vector<3x256xf32>
    %399 = arith.select %397, %394, %398 : vector<3x256xi1>, vector<3x256xf32>
    %c0_128 = arith.constant 0 : index
    %c15 = arith.constant 15 : index
    %400 = memref.load %arg10[%c0_128, %c15] : memref<3x25xf32, #tpu.memory_space<smem>>
    %401 = vector.extract_strided_slice %399 {offsets = [0, 0], sizes = [1, 256], strides = [1, 1]} : vector<3x256xf32> to vector<1x256xf32>
    %402 = vector.broadcast %400 : f32 to vector<1x256xf32>
    %403 = arith.mulf %402, %401 : vector<1x256xf32>
    %404 = arith.addf %393, %403 : vector<1x256xf32>
    %c1_129 = arith.constant 1 : index
    %c15_130 = arith.constant 15 : index
    %405 = memref.load %arg10[%c1_129, %c15_130] : memref<3x25xf32, #tpu.memory_space<smem>>
    %406 = vector.extract_strided_slice %399 {offsets = [1, 0], sizes = [1, 256], strides = [1, 1]} : vector<3x256xf32> to vector<1x256xf32>
    %407 = vector.broadcast %405 : f32 to vector<1x256xf32>
    %408 = arith.mulf %407, %406 : vector<1x256xf32>
    %409 = arith.addf %404, %408 : vector<1x256xf32>
    %c2_131 = arith.constant 2 : index
    %c15_132 = arith.constant 15 : index
    %410 = memref.load %arg10[%c2_131, %c15_132] : memref<3x25xf32, #tpu.memory_space<smem>>
    %411 = vector.extract_strided_slice %399 {offsets = [2, 0], sizes = [1, 256], strides = [1, 1]} : vector<3x256xf32> to vector<1x256xf32>
    %412 = vector.broadcast %410 : f32 to vector<1x256xf32>
    %413 = arith.mulf %412, %411 : vector<1x256xf32>
    %414 = arith.addf %409, %413 : vector<1x256xf32>
    %c241_i32 = arith.constant 241 : i32
    %415 = tpu.dynamic_rotate %70 by %c241_i32 dim 1 : vector<3x256xf32>, i32 -> vector<3x256xf32>
    %416 = arith.andi %82, %76 : vector<1x256xi1>
    %cst_133 = arith.constant 0.000000e+00 : f32
    %417 = vector.shape_cast %416 : vector<1x256xi1> to vector<1x256xi1>
    %418 = vector.broadcast %417 : vector<1x256xi1> to vector<3x256xi1>
    %419 = vector.broadcast %cst_133 : f32 to vector<3x256xf32>
    %420 = arith.select %418, %415, %419 : vector<3x256xi1>, vector<3x256xf32>
    %c0_134 = arith.constant 0 : index
    %c16 = arith.constant 16 : index
    %421 = memref.load %arg10[%c0_134, %c16] : memref<3x25xf32, #tpu.memory_space<smem>>
    %422 = vector.extract_strided_slice %420 {offsets = [0, 0], sizes = [1, 256], strides = [1, 1]} : vector<3x256xf32> to vector<1x256xf32>
    %423 = vector.broadcast %421 : f32 to vector<1x256xf32>
    %424 = arith.mulf %423, %422 : vector<1x256xf32>
    %425 = arith.addf %414, %424 : vector<1x256xf32>
    %c1_135 = arith.constant 1 : index
    %c16_136 = arith.constant 16 : index
    %426 = memref.load %arg10[%c1_135, %c16_136] : memref<3x25xf32, #tpu.memory_space<smem>>
    %427 = vector.extract_strided_slice %420 {offsets = [1, 0], sizes = [1, 256], strides = [1, 1]} : vector<3x256xf32> to vector<1x256xf32>
    %428 = vector.broadcast %426 : f32 to vector<1x256xf32>
    %429 = arith.mulf %428, %427 : vector<1x256xf32>
    %430 = arith.addf %425, %429 : vector<1x256xf32>
    %c2_137 = arith.constant 2 : index
    %c16_138 = arith.constant 16 : index
    %431 = memref.load %arg10[%c2_137, %c16_138] : memref<3x25xf32, #tpu.memory_space<smem>>
    %432 = vector.extract_strided_slice %420 {offsets = [2, 0], sizes = [1, 256], strides = [1, 1]} : vector<3x256xf32> to vector<1x256xf32>
    %433 = vector.broadcast %431 : f32 to vector<1x256xf32>
    %434 = arith.mulf %433, %432 : vector<1x256xf32>
    %435 = arith.addf %430, %434 : vector<1x256xf32>
    %c240_i32 = arith.constant 240 : i32
    %436 = tpu.dynamic_rotate %70 by %c240_i32 dim 1 : vector<3x256xf32>, i32 -> vector<3x256xf32>
    %cst_139 = arith.constant 0.000000e+00 : f32
    %437 = vector.shape_cast %82 : vector<1x256xi1> to vector<1x256xi1>
    %438 = vector.broadcast %437 : vector<1x256xi1> to vector<3x256xi1>
    %439 = vector.broadcast %cst_139 : f32 to vector<3x256xf32>
    %440 = arith.select %438, %436, %439 : vector<3x256xi1>, vector<3x256xf32>
    %c0_140 = arith.constant 0 : index
    %c17 = arith.constant 17 : index
    %441 = memref.load %arg10[%c0_140, %c17] : memref<3x25xf32, #tpu.memory_space<smem>>
    %442 = vector.extract_strided_slice %440 {offsets = [0, 0], sizes = [1, 256], strides = [1, 1]} : vector<3x256xf32> to vector<1x256xf32>
    %443 = vector.broadcast %441 : f32 to vector<1x256xf32>
    %444 = arith.mulf %443, %442 : vector<1x256xf32>
    %445 = arith.addf %435, %444 : vector<1x256xf32>
    %c1_141 = arith.constant 1 : index
    %c17_142 = arith.constant 17 : index
    %446 = memref.load %arg10[%c1_141, %c17_142] : memref<3x25xf32, #tpu.memory_space<smem>>
    %447 = vector.extract_strided_slice %440 {offsets = [1, 0], sizes = [1, 256], strides = [1, 1]} : vector<3x256xf32> to vector<1x256xf32>
    %448 = vector.broadcast %446 : f32 to vector<1x256xf32>
    %449 = arith.mulf %448, %447 : vector<1x256xf32>
    %450 = arith.addf %445, %449 : vector<1x256xf32>
    %c2_143 = arith.constant 2 : index
    %c17_144 = arith.constant 17 : index
    %451 = memref.load %arg10[%c2_143, %c17_144] : memref<3x25xf32, #tpu.memory_space<smem>>
    %452 = vector.extract_strided_slice %440 {offsets = [2, 0], sizes = [1, 256], strides = [1, 1]} : vector<3x256xf32> to vector<1x256xf32>
    %453 = vector.broadcast %451 : f32 to vector<1x256xf32>
    %454 = arith.mulf %453, %452 : vector<1x256xf32>
    %455 = arith.addf %450, %454 : vector<1x256xf32>
    %c239_i32 = arith.constant 239 : i32
    %456 = tpu.dynamic_rotate %70 by %c239_i32 dim 1 : vector<3x256xf32>, i32 -> vector<3x256xf32>
    %457 = arith.andi %82, %80 : vector<1x256xi1>
    %cst_145 = arith.constant 0.000000e+00 : f32
    %458 = vector.shape_cast %457 : vector<1x256xi1> to vector<1x256xi1>
    %459 = vector.broadcast %458 : vector<1x256xi1> to vector<3x256xi1>
    %460 = vector.broadcast %cst_145 : f32 to vector<3x256xf32>
    %461 = arith.select %459, %456, %460 : vector<3x256xi1>, vector<3x256xf32>
    %c0_146 = arith.constant 0 : index
    %c18 = arith.constant 18 : index
    %462 = memref.load %arg10[%c0_146, %c18] : memref<3x25xf32, #tpu.memory_space<smem>>
    %463 = vector.extract_strided_slice %461 {offsets = [0, 0], sizes = [1, 256], strides = [1, 1]} : vector<3x256xf32> to vector<1x256xf32>
    %464 = vector.broadcast %462 : f32 to vector<1x256xf32>
    %465 = arith.mulf %464, %463 : vector<1x256xf32>
    %466 = arith.addf %455, %465 : vector<1x256xf32>
    %c1_147 = arith.constant 1 : index
    %c18_148 = arith.constant 18 : index
    %467 = memref.load %arg10[%c1_147, %c18_148] : memref<3x25xf32, #tpu.memory_space<smem>>
    %468 = vector.extract_strided_slice %461 {offsets = [1, 0], sizes = [1, 256], strides = [1, 1]} : vector<3x256xf32> to vector<1x256xf32>
    %469 = vector.broadcast %467 : f32 to vector<1x256xf32>
    %470 = arith.mulf %469, %468 : vector<1x256xf32>
    %471 = arith.addf %466, %470 : vector<1x256xf32>
    %c2_149 = arith.constant 2 : index
    %c18_150 = arith.constant 18 : index
    %472 = memref.load %arg10[%c2_149, %c18_150] : memref<3x25xf32, #tpu.memory_space<smem>>
    %473 = vector.extract_strided_slice %461 {offsets = [2, 0], sizes = [1, 256], strides = [1, 1]} : vector<3x256xf32> to vector<1x256xf32>
    %474 = vector.broadcast %472 : f32 to vector<1x256xf32>
    %475 = arith.mulf %474, %473 : vector<1x256xf32>
    %476 = arith.addf %471, %475 : vector<1x256xf32>
    %c238_i32 = arith.constant 238 : i32
    %477 = tpu.dynamic_rotate %70 by %c238_i32 dim 1 : vector<3x256xf32>, i32 -> vector<3x256xf32>
    %478 = arith.andi %82, %84 : vector<1x256xi1>
    %cst_151 = arith.constant 0.000000e+00 : f32
    %479 = vector.shape_cast %478 : vector<1x256xi1> to vector<1x256xi1>
    %480 = vector.broadcast %479 : vector<1x256xi1> to vector<3x256xi1>
    %481 = vector.broadcast %cst_151 : f32 to vector<3x256xf32>
    %482 = arith.select %480, %477, %481 : vector<3x256xi1>, vector<3x256xf32>
    %c0_152 = arith.constant 0 : index
    %c19 = arith.constant 19 : index
    %483 = memref.load %arg10[%c0_152, %c19] : memref<3x25xf32, #tpu.memory_space<smem>>
    %484 = vector.extract_strided_slice %482 {offsets = [0, 0], sizes = [1, 256], strides = [1, 1]} : vector<3x256xf32> to vector<1x256xf32>
    %485 = vector.broadcast %483 : f32 to vector<1x256xf32>
    %486 = arith.mulf %485, %484 : vector<1x256xf32>
    %487 = arith.addf %476, %486 : vector<1x256xf32>
    %c1_153 = arith.constant 1 : index
    %c19_154 = arith.constant 19 : index
    %488 = memref.load %arg10[%c1_153, %c19_154] : memref<3x25xf32, #tpu.memory_space<smem>>
    %489 = vector.extract_strided_slice %482 {offsets = [1, 0], sizes = [1, 256], strides = [1, 1]} : vector<3x256xf32> to vector<1x256xf32>
    %490 = vector.broadcast %488 : f32 to vector<1x256xf32>
    %491 = arith.mulf %490, %489 : vector<1x256xf32>
    %492 = arith.addf %487, %491 : vector<1x256xf32>
    %c2_155 = arith.constant 2 : index
    %c19_156 = arith.constant 19 : index
    %493 = memref.load %arg10[%c2_155, %c19_156] : memref<3x25xf32, #tpu.memory_space<smem>>
    %494 = vector.extract_strided_slice %482 {offsets = [2, 0], sizes = [1, 256], strides = [1, 1]} : vector<3x256xf32> to vector<1x256xf32>
    %495 = vector.broadcast %493 : f32 to vector<1x256xf32>
    %496 = arith.mulf %495, %494 : vector<1x256xf32>
    %497 = arith.addf %492, %496 : vector<1x256xf32>
    %c226_i32 = arith.constant 226 : i32
    %498 = tpu.dynamic_rotate %70 by %c226_i32 dim 1 : vector<3x256xf32>, i32 -> vector<3x256xf32>
    %499 = arith.andi %86, %72 : vector<1x256xi1>
    %cst_157 = arith.constant 0.000000e+00 : f32
    %500 = vector.shape_cast %499 : vector<1x256xi1> to vector<1x256xi1>
    %501 = vector.broadcast %500 : vector<1x256xi1> to vector<3x256xi1>
    %502 = vector.broadcast %cst_157 : f32 to vector<3x256xf32>
    %503 = arith.select %501, %498, %502 : vector<3x256xi1>, vector<3x256xf32>
    %c0_158 = arith.constant 0 : index
    %c20 = arith.constant 20 : index
    %504 = memref.load %arg10[%c0_158, %c20] : memref<3x25xf32, #tpu.memory_space<smem>>
    %505 = vector.extract_strided_slice %503 {offsets = [0, 0], sizes = [1, 256], strides = [1, 1]} : vector<3x256xf32> to vector<1x256xf32>
    %506 = vector.broadcast %504 : f32 to vector<1x256xf32>
    %507 = arith.mulf %506, %505 : vector<1x256xf32>
    %508 = arith.addf %497, %507 : vector<1x256xf32>
    %c1_159 = arith.constant 1 : index
    %c20_160 = arith.constant 20 : index
    %509 = memref.load %arg10[%c1_159, %c20_160] : memref<3x25xf32, #tpu.memory_space<smem>>
    %510 = vector.extract_strided_slice %503 {offsets = [1, 0], sizes = [1, 256], strides = [1, 1]} : vector<3x256xf32> to vector<1x256xf32>
    %511 = vector.broadcast %509 : f32 to vector<1x256xf32>
    %512 = arith.mulf %511, %510 : vector<1x256xf32>
    %513 = arith.addf %508, %512 : vector<1x256xf32>
    %c2_161 = arith.constant 2 : index
    %c20_162 = arith.constant 20 : index
    %514 = memref.load %arg10[%c2_161, %c20_162] : memref<3x25xf32, #tpu.memory_space<smem>>
    %515 = vector.extract_strided_slice %503 {offsets = [2, 0], sizes = [1, 256], strides = [1, 1]} : vector<3x256xf32> to vector<1x256xf32>
    %516 = vector.broadcast %514 : f32 to vector<1x256xf32>
    %517 = arith.mulf %516, %515 : vector<1x256xf32>
    %518 = arith.addf %513, %517 : vector<1x256xf32>
    %c225_i32 = arith.constant 225 : i32
    %519 = tpu.dynamic_rotate %70 by %c225_i32 dim 1 : vector<3x256xf32>, i32 -> vector<3x256xf32>
    %520 = arith.andi %86, %76 : vector<1x256xi1>
    %cst_163 = arith.constant 0.000000e+00 : f32
    %521 = vector.shape_cast %520 : vector<1x256xi1> to vector<1x256xi1>
    %522 = vector.broadcast %521 : vector<1x256xi1> to vector<3x256xi1>
    %523 = vector.broadcast %cst_163 : f32 to vector<3x256xf32>
    %524 = arith.select %522, %519, %523 : vector<3x256xi1>, vector<3x256xf32>
    %c0_164 = arith.constant 0 : index
    %c21 = arith.constant 21 : index
    %525 = memref.load %arg10[%c0_164, %c21] : memref<3x25xf32, #tpu.memory_space<smem>>
    %526 = vector.extract_strided_slice %524 {offsets = [0, 0], sizes = [1, 256], strides = [1, 1]} : vector<3x256xf32> to vector<1x256xf32>
    %527 = vector.broadcast %525 : f32 to vector<1x256xf32>
    %528 = arith.mulf %527, %526 : vector<1x256xf32>
    %529 = arith.addf %518, %528 : vector<1x256xf32>
    %c1_165 = arith.constant 1 : index
    %c21_166 = arith.constant 21 : index
    %530 = memref.load %arg10[%c1_165, %c21_166] : memref<3x25xf32, #tpu.memory_space<smem>>
    %531 = vector.extract_strided_slice %524 {offsets = [1, 0], sizes = [1, 256], strides = [1, 1]} : vector<3x256xf32> to vector<1x256xf32>
    %532 = vector.broadcast %530 : f32 to vector<1x256xf32>
    %533 = arith.mulf %532, %531 : vector<1x256xf32>
    %534 = arith.addf %529, %533 : vector<1x256xf32>
    %c2_167 = arith.constant 2 : index
    %c21_168 = arith.constant 21 : index
    %535 = memref.load %arg10[%c2_167, %c21_168] : memref<3x25xf32, #tpu.memory_space<smem>>
    %536 = vector.extract_strided_slice %524 {offsets = [2, 0], sizes = [1, 256], strides = [1, 1]} : vector<3x256xf32> to vector<1x256xf32>
    %537 = vector.broadcast %535 : f32 to vector<1x256xf32>
    %538 = arith.mulf %537, %536 : vector<1x256xf32>
    %539 = arith.addf %534, %538 : vector<1x256xf32>
    %c224_i32 = arith.constant 224 : i32
    %540 = tpu.dynamic_rotate %70 by %c224_i32 dim 1 : vector<3x256xf32>, i32 -> vector<3x256xf32>
    %cst_169 = arith.constant 0.000000e+00 : f32
    %541 = vector.shape_cast %86 : vector<1x256xi1> to vector<1x256xi1>
    %542 = vector.broadcast %541 : vector<1x256xi1> to vector<3x256xi1>
    %543 = vector.broadcast %cst_169 : f32 to vector<3x256xf32>
    %544 = arith.select %542, %540, %543 : vector<3x256xi1>, vector<3x256xf32>
    %c0_170 = arith.constant 0 : index
    %c22 = arith.constant 22 : index
    %545 = memref.load %arg10[%c0_170, %c22] : memref<3x25xf32, #tpu.memory_space<smem>>
    %546 = vector.extract_strided_slice %544 {offsets = [0, 0], sizes = [1, 256], strides = [1, 1]} : vector<3x256xf32> to vector<1x256xf32>
    %547 = vector.broadcast %545 : f32 to vector<1x256xf32>
    %548 = arith.mulf %547, %546 : vector<1x256xf32>
    %549 = arith.addf %539, %548 : vector<1x256xf32>
    %c1_171 = arith.constant 1 : index
    %c22_172 = arith.constant 22 : index
    %550 = memref.load %arg10[%c1_171, %c22_172] : memref<3x25xf32, #tpu.memory_space<smem>>
    %551 = vector.extract_strided_slice %544 {offsets = [1, 0], sizes = [1, 256], strides = [1, 1]} : vector<3x256xf32> to vector<1x256xf32>
    %552 = vector.broadcast %550 : f32 to vector<1x256xf32>
    %553 = arith.mulf %552, %551 : vector<1x256xf32>
    %554 = arith.addf %549, %553 : vector<1x256xf32>
    %c2_173 = arith.constant 2 : index
    %c22_174 = arith.constant 22 : index
    %555 = memref.load %arg10[%c2_173, %c22_174] : memref<3x25xf32, #tpu.memory_space<smem>>
    %556 = vector.extract_strided_slice %544 {offsets = [2, 0], sizes = [1, 256], strides = [1, 1]} : vector<3x256xf32> to vector<1x256xf32>
    %557 = vector.broadcast %555 : f32 to vector<1x256xf32>
    %558 = arith.mulf %557, %556 : vector<1x256xf32>
    %559 = arith.addf %554, %558 : vector<1x256xf32>
    %c223_i32 = arith.constant 223 : i32
    %560 = tpu.dynamic_rotate %70 by %c223_i32 dim 1 : vector<3x256xf32>, i32 -> vector<3x256xf32>
    %561 = arith.andi %86, %80 : vector<1x256xi1>
    %cst_175 = arith.constant 0.000000e+00 : f32
    %562 = vector.shape_cast %561 : vector<1x256xi1> to vector<1x256xi1>
    %563 = vector.broadcast %562 : vector<1x256xi1> to vector<3x256xi1>
    %564 = vector.broadcast %cst_175 : f32 to vector<3x256xf32>
    %565 = arith.select %563, %560, %564 : vector<3x256xi1>, vector<3x256xf32>
    %c0_176 = arith.constant 0 : index
    %c23 = arith.constant 23 : index
    %566 = memref.load %arg10[%c0_176, %c23] : memref<3x25xf32, #tpu.memory_space<smem>>
    %567 = vector.extract_strided_slice %565 {offsets = [0, 0], sizes = [1, 256], strides = [1, 1]} : vector<3x256xf32> to vector<1x256xf32>
    %568 = vector.broadcast %566 : f32 to vector<1x256xf32>
    %569 = arith.mulf %568, %567 : vector<1x256xf32>
    %570 = arith.addf %559, %569 : vector<1x256xf32>
    %c1_177 = arith.constant 1 : index
    %c23_178 = arith.constant 23 : index
    %571 = memref.load %arg10[%c1_177, %c23_178] : memref<3x25xf32, #tpu.memory_space<smem>>
    %572 = vector.extract_strided_slice %565 {offsets = [1, 0], sizes = [1, 256], strides = [1, 1]} : vector<3x256xf32> to vector<1x256xf32>
    %573 = vector.broadcast %571 : f32 to vector<1x256xf32>
    %574 = arith.mulf %573, %572 : vector<1x256xf32>
    %575 = arith.addf %570, %574 : vector<1x256xf32>
    %c2_179 = arith.constant 2 : index
    %c23_180 = arith.constant 23 : index
    %576 = memref.load %arg10[%c2_179, %c23_180] : memref<3x25xf32, #tpu.memory_space<smem>>
    %577 = vector.extract_strided_slice %565 {offsets = [2, 0], sizes = [1, 256], strides = [1, 1]} : vector<3x256xf32> to vector<1x256xf32>
    %578 = vector.broadcast %576 : f32 to vector<1x256xf32>
    %579 = arith.mulf %578, %577 : vector<1x256xf32>
    %580 = arith.addf %575, %579 : vector<1x256xf32>
    %c222_i32 = arith.constant 222 : i32
    %581 = tpu.dynamic_rotate %70 by %c222_i32 dim 1 : vector<3x256xf32>, i32 -> vector<3x256xf32>
    %582 = arith.andi %86, %84 : vector<1x256xi1>
    %cst_181 = arith.constant 0.000000e+00 : f32
    %583 = vector.shape_cast %582 : vector<1x256xi1> to vector<1x256xi1>
    %584 = vector.broadcast %583 : vector<1x256xi1> to vector<3x256xi1>
    %585 = vector.broadcast %cst_181 : f32 to vector<3x256xf32>
    %586 = arith.select %584, %581, %585 : vector<3x256xi1>, vector<3x256xf32>
    %c0_182 = arith.constant 0 : index
    %c24 = arith.constant 24 : index
    %587 = memref.load %arg10[%c0_182, %c24] : memref<3x25xf32, #tpu.memory_space<smem>>
    %588 = vector.extract_strided_slice %586 {offsets = [0, 0], sizes = [1, 256], strides = [1, 1]} : vector<3x256xf32> to vector<1x256xf32>
    %589 = vector.broadcast %587 : f32 to vector<1x256xf32>
    %590 = arith.mulf %589, %588 : vector<1x256xf32>
    %591 = arith.addf %580, %590 : vector<1x256xf32>
    %c1_183 = arith.constant 1 : index
    %c24_184 = arith.constant 24 : index
    %592 = memref.load %arg10[%c1_183, %c24_184] : memref<3x25xf32, #tpu.memory_space<smem>>
    %593 = vector.extract_strided_slice %586 {offsets = [1, 0], sizes = [1, 256], strides = [1, 1]} : vector<3x256xf32> to vector<1x256xf32>
    %594 = vector.broadcast %592 : f32 to vector<1x256xf32>
    %595 = arith.mulf %594, %593 : vector<1x256xf32>
    %596 = arith.addf %591, %595 : vector<1x256xf32>
    %c2_185 = arith.constant 2 : index
    %c24_186 = arith.constant 24 : index
    %597 = memref.load %arg10[%c2_185, %c24_186] : memref<3x25xf32, #tpu.memory_space<smem>>
    %598 = vector.extract_strided_slice %586 {offsets = [2, 0], sizes = [1, 256], strides = [1, 1]} : vector<3x256xf32> to vector<1x256xf32>
    %599 = vector.broadcast %597 : f32 to vector<1x256xf32>
    %600 = arith.mulf %599, %598 : vector<1x256xf32>
    %601 = arith.addf %596, %600 : vector<1x256xf32>
    %cst_187 = arith.constant dense<0.000000e+00> : vector<1xf32>
    %602 = vector.multi_reduction <add>, %601, %cst_187 [1] : vector<1x256xf32> to vector<1xf32>
    %603 = vector.shape_cast %602 : vector<1xf32> to vector<1x1xf32>
    %cst_188 = arith.constant 2.560000e+02 : f32
    %604 = vector.broadcast %cst_188 : f32 to vector<1x1xf32>
    %605 = arith.divf %603, %604 : vector<1x1xf32>
    %606 = vector.broadcast %605 : vector<1x1xf32> to vector<1x256xf32>
    %607 = arith.subf %601, %606 : vector<1x256xf32>
    %608 = arith.mulf %607, %607 : vector<1x256xf32>
    %cst_189 = arith.constant dense<0.000000e+00> : vector<1xf32>
    %609 = vector.multi_reduction <add>, %608, %cst_189 [1] : vector<1x256xf32> to vector<1xf32>
    %610 = vector.shape_cast %609 : vector<1xf32> to vector<1x1xf32>
    %cst_190 = arith.constant 2.560000e+02 : f32
    %611 = vector.broadcast %cst_190 : f32 to vector<1x1xf32>
    %612 = arith.divf %610, %611 : vector<1x1xf32>
    %613 = vector.broadcast %605 : vector<1x1xf32> to vector<1x256xf32>
    %614 = arith.subf %601, %613 : vector<1x256xf32>
    %cst_191 = arith.constant 9.99999974E-6 : f32
    %615 = vector.broadcast %cst_191 : f32 to vector<1x1xf32>
    %616 = arith.addf %612, %615 : vector<1x1xf32>
    %617 = math.rsqrt %616 : vector<1x1xf32>
    %618 = vector.broadcast %617 : vector<1x1xf32> to vector<1x256xf32>
    %619 = arith.mulf %614, %618 : vector<1x256xf32>
    %620 = vector.broadcast %619 : vector<1x256xf32> to vector<4x256xf32>
    %621 = arith.mulf %1, %620 : vector<4x256xf32>
    %c0_192 = arith.constant 0 : index
    %c0_193 = arith.constant 0 : index
    %c0_194 = arith.constant 0 : index
    %622 = vector.load %arg12[%c0_192, %c0_193, %c0_194] : memref<1x4x256xf32, #tpu.memory_space<vmem>>, vector<1x4x256xf32>
    %623 = vector.shape_cast %622 : vector<1x4x256xf32> to vector<4x256xf32>
    %624 = vector.shape_cast %621 : vector<4x256xf32> to vector<1x4x256xf32>
    tpu.vector_store %arg12[%c0_192, %c0_193, %c0_194], %624 {strides = array<i32>} : memref<1x4x256xf32, #tpu.memory_space<vmem>>, vector<1x4x256xf32>,
    return
  }
  func.func @transform_0(%arg0: i32, %arg1: memref<2x2xi32, #tpu.memory_space<smem>>) -> (i32, i32, i32) {
    %c0_i32 = arith.constant 0 : i32
    %c0_i32_0 = arith.constant 0 : i32
    %c0_i32_1 = arith.constant 0 : i32
    return %arg0, %c0_i32, %c0_i32_0 : i32, i32, i32
  }
  func.func @transform_1(%arg0: i32, %arg1: memref<2x2xi32, #tpu.memory_space<smem>>) -> (i32, i32) {
    %c0_i32 = arith.constant 0 : i32
    %c0_i32_0 = arith.constant 0 : i32
    %c0_i32_1 = arith.constant 0 : i32
    return %c0_i32, %c0_i32_0 : i32, i32
  }
  func.func @transform_2(%arg0: i32, %arg1: memref<2x2xi32, #tpu.memory_space<smem>>) -> (i32, i32) {
    %c0_i32 = arith.constant 0 : i32
    %c0_i32_0 = arith.constant 0 : i32
    %c0_i32_1 = arith.constant 0 : i32
    return %c0_i32, %c0_i32_0 : i32, i32
  }
  func.func @transform_3(%arg0: i32, %arg1: memref<2x2xi32, #tpu.memory_space<smem>>) -> (i32, i32) {
    %c0_i32 = arith.constant 0 : i32
    %c0_i32_0 = arith.constant 0 : i32
    %c0_i32_1 = arith.constant 0 : i32
    return %c0_i32, %c0_i32_0 : i32, i32
  }
  func.func @transform_4(%arg0: i32, %arg1: memref<2x2xi32, #tpu.memory_space<smem>>) -> (i32, i32) {
    %c0_i32 = arith.constant 0 : i32
    %c0_i32_0 = arith.constant 0 : i32
    %c0_i32_1 = arith.constant 0 : i32
    return %c0_i32, %c0_i32_0 : i32, i32
  }
  func.func @transform_5(%arg0: i32, %arg1: memref<2x2xi32, #tpu.memory_space<smem>>) -> (i32, i32) {
    %c0_i32 = arith.constant 0 : i32
    %c0_i32_0 = arith.constant 0 : i32
    %c0_i32_1 = arith.constant 0 : i32
    return %c0_i32, %c0_i32_0 : i32, i32
  }
  func.func @transform_6(%arg0: i32, %arg1: memref<2x2xi32, #tpu.memory_space<smem>>) -> (i32, i32) {
    %c0_i32 = arith.constant 0 : i32
    %c0_i32_0 = arith.constant 0 : i32
    %c0_i32_1 = arith.constant 0 : i32
    return %c0_i32, %c0_i32_0 : i32, i32
  }
  func.func @transform_7(%arg0: i32, %arg1: memref<2x2xi32, #tpu.memory_space<smem>>) -> (i32, i32) {
    %c0_i32 = arith.constant 0 : i32
    %c0_i32_0 = arith.constant 0 : i32
    %c0_i32_1 = arith.constant 0 : i32
    return %c0_i32, %c0_i32_0 : i32, i32
  }
  func.func @transform_8(%arg0: i32, %arg1: memref<2x2xi32, #tpu.memory_space<smem>>) -> (i32, i32) {
    %c0_i32 = arith.constant 0 : i32
    %c0_i32_0 = arith.constant 0 : i32
    %c0_i32_1 = arith.constant 0 : i32
    return %c0_i32, %c0_i32_0 : i32, i32
  }
  func.func @transform_9(%arg0: i32, %arg1: memref<2x2xi32, #tpu.memory_space<smem>>) -> i32 {
    %c0_i32 = arith.constant 0 : i32
    %c0_i32_0 = arith.constant 0 : i32
    return %c0_i32 : i32
  }
  func.func @transform_10(%arg0: i32, %arg1: memref<2x2xi32, #tpu.memory_space<smem>>) -> (i32, i32, i32) {
    %c0_i32 = arith.constant 0 : i32
    %c0_i32_0 = arith.constant 0 : i32
    %c0_i32_1 = arith.constant 0 : i32
    return %arg0, %c0_i32, %c0_i32_0 : i32, i32, i32
  }
}

</mosaic_0001>

<bundles_post_ra>
// kernel: tpu_custom_call.1
= control target key start
LH: loop header
LB: loop body
LE: loop exit
PB: predicated region body
PF: predicated region fallthrough
CT: control target
= control target key end

     0   :  { %s2174_s22 = smov [#allocation3]   ;;  %s3401_s0 = inlined_call_operand.vmem [shape: s32[2,2], index: 0, kind: input, shape index: {}]   ;;  %s3402_s1 = inlined_call_operand.hbm [shape: f32[2,4,256], index: 1, kind: input, shape index: {}]   ;;  %s3403_s2 = inlined_call_operand.vmem [shape: f32[2,4], index: 2, kind: input, shape index: {}]   ;;  %s3404_s3 = inlined_call_operand.vmem [shape: f32[4,4], index: 3, kind: input, shape index: {}]   ;;  %s3405_s4 = inlined_call_operand.vmem [shape: f32[4,1], index: 4, kind: input, shape index: {}]   ;;  %s3406_s5 = inlined_call_operand.vmem [shape: f32[4,1], index: 5, kind: input, shape index: {}]   ;;  %s3407_s6 = inlined_call_operand.vmem [shape: f32[4,1], index: 6, kind: input, shape index: {}]   ;;  %s3408_s7 = inlined_call_operand.vmem [shape: f32[1,256], index: 7, kind: input, shape index: {}]   ;;  %s3409_s8 = inlined_call_operand.vmem [shape: f32[1,256], index: 8, kind: input, shape index: {}]   ;;  %s3410_s9 = inlined_call_operand.vmem [shape: f32[3,25], index: 9, kind: input, shape index: {}]   ;;  %s3411_s10 = inlined_call_operand.<no memory space> [shape: f32[1], index: 10, kind: input, shape index: {}]   ;;  %s3412_s11 = inlined_call_operand.hbm [shape: f32[2,4,256], index: 11, kind: output, shape index: {}]  }
   0x1   :  { %3419 = sst [smem:[#allocation20_spill]] %s3402_s1  ;;  %s17_s19 = sshll.u32 %s3401_s0, 4  ;;  %s18_s19 = int_to_ptr.vmem [resolvable:$true] %s17_s19 }
   0x2   :  { %3420 = sst [smem:[#allocation21_spill]] %s3403_s2 }
   0x3   :  { %3421 = sst [smem:[#allocation22_spill]] %s3404_s3 }
   0x4   :  { %3422 = sst [smem:[#allocation23_spill]] %s3405_s4 }
   0x5   :  { %3423 = sst [smem:[#allocation24_spill]] %s3406_s5 }
   0x6   :  { %3424 = sst [smem:[#allocation25_spill]] %s3407_s6 }
   0x7   :  { %3425 = sst [smem:[#allocation26_spill]] %s3408_s7 }
   0x8   :  { %3426 = sst [smem:[#allocation27_spill]] %s3410_s9 }
   0x9   :  { %21 = sst [smem:[#allocation4]] %s3411_s10 }
   0xa   :  { %20 = dma.vmem_to_smem %s18_s19, 32, %s2174_s22, [#allocation2] }
   0xb   :  { %2140 = dma.done.wait [#allocation2], 32 }
   0xc   :  { %2141 = vsyncadd [#allocation2], 4294967264 }
   0xd   :  { %24 = sfence }
   0xe   :  { %25 = vsyncpa [#allocation6], 0 }
   0xf   :  { %27 = vsyncpa [#allocation6 + $0x1], 0 }
  0x10   :  { %28 = vsyncpa [#allocation8], 0 }
  0x11   :  { %29 = vsyncpa [#allocation11], 0 }
  0x12   :  { %30 = vsyncpa [#allocation7], 0 }
  0x13   :  { %32 = vsyncpa [#allocation7 + $0x1], 0  ;;  %s2272_s23 = smov 0   ;;  %s2274_s24 = smov 0  }
  0x14   :  { %s2276_s0 = smov 0   ;;  %s2278_s25 = smov 0  }
  0x15 LB: > { %3427 = sst [smem:[#allocation18_spill]] %s2168_s0  ;;  %s2293_s10 = sadd.s32 4294967295, %s2172_s25   ;;  %s2172_s25 = sphi %s2278_s25, %s3498_s25   ;;  %s2168_s0 = sphi %s2276_s0, %s3495_s0   ;;  %s2164_s24 = sphi %s2274_s24, %s3497_s24   ;;  %s2160_s23 = sphi %s2272_s23, %s3496_s23  }
  0x16   : > { %s1820_s26 = sadd.s32 4294967294, %s2172_s25   ;;  %p58_p0 = scmp.ne.s32.totalorder %s2164_s24, %s2160_s23 }
  0x17   : > { %p59_p1 = scmp.eq.s32.totalorder %s2293_s10, 0  ;;  %p271_p2 = scmp.eq.s32.totalorder %s2293_s10, 1 }
  0x18   : > { %p277_p3 = scmp.eq.s32.totalorder %s1820_s26, 1  ;;  %p1821_p5 = scmp.ge.s32.totalorder %s2172_s25, 1 }
  0x19   : > { %p2302_p4 = por %p59_p1, %p58_p0  ;;  %p284_p7 = scmp.lt.s32.totalorder %s2172_s25, 3 }
  0x1a   : > { %p2307_p6 = por %p277_p3, %p58_p0  ;;  %s3430_s2 = sld [smem:[#allocation21_spill]] }
  0x1b   : > { %p2315_p8 = pnand %p1821_p5, %p284_p7  ;;  %s3432_s9 = sld [smem:[#allocation27_spill]] }
  0x1c   : > { %s2328_s17 = sadd.s32 1, %s2172_s25   ;;  %s2175_s19 = smov [#allocation9]  }
  0x1d   : > { %p1927_p10 = pneg %p2315_p8  ;;  %s42_s18 = ssub.s32 %s2172_s25, %s2328_s17 }
  0x1e   : > { %s2176_s20 = smov [#allocation10]   ;;  %p43_p12 = scmp.eq.s32.totalorder %s42_s18, 0 }
  0x1f   : > { %p1928_p11 = pnand %p1927_p10, %p59_p1  ;;  %s45_s21 = sadd.s32 1, %s2168_s0 }
  0x20   : > { %s296_s12 = sshll.u32 %s3430_s2, 4  ;;  %p52_p13 = scmp.ne.s32.totalorder %s2168_s0, %s2164_s24  ;;  %s297_s12 = int_to_ptr.vmem [resolvable:$true] %s296_s12 }
  0x21   : > { %s324_s16 = sshll.u32 %s3432_s9, 4  ;;  %p53_p0 = scmp.eq.s32.totalorder %s2172_s25, 0  ;;  %s325_s16 = int_to_ptr.vmem [resolvable:$true] %s324_s16 }
  0x22   : > { %1930 = dma.vmem_to_smem (!%p1928_p11), %s297_s12, 32, %s2175_s19, [#allocation8]  }
  0x23   : > { %1933 = dma.vmem_to_smem (!%p1928_p11), %s325_s16, 64, %s2176_s20, [#allocation11]  }
  0x24   : > { %s2337_s22 = scalar_select %p43_p12, %s2168_s0, %s45_s21  }
  0x25   : > { %p54_p3 = por %p53_p0, %p52_p13  ;;  %p2341_p5 = por %p271_p2, %p52_p13 }
  0x26   : > { %3433 = sst [smem:[#allocation19_spill]] %s2337_s22  ;;  %p1944_p7 = scmp.lt.s32.totalorder %s2172_s25, 2 }
  0x27   : > { %s338_s29 = sand.u32 1, %s2168_s0   ;;  %s1913_s14 = sshll.u32 %s2172_s25, 3 }
  0x28   : > { %s1825_s30 = sshll.u32 %s338_s29, 3  ;;  %s3435_s1 = sld [smem:[#allocation20_spill]] }
  0x29   : > { %s342_s18 = scalar_lea.vmem [#allocation5], %s1825_s30  ;;  %p2351_p10 = pnand %p1944_p7, %p54_p3 }
  0x2a   : > { %s351_s19 = sshll.u32 %s342_s18, 4  ;;  %s339_s2 = scalar_lea.sflag [#allocation6], %s338_s29  ;;  %s352_s19 = int_to_ptr.vmem [resolvable:$true] %s351_s19 }
  0x2b   : > { %p2070_p11 = pneg %p2351_p10 }
  0x2e   : > { %s347_s16 = scalar_lea.hbm %s3435_s1, %s1913_s14  ;;  %s2073_s15 = scalar_lea.hbm %s3435_s1, 16 }
  0x2f   : > { %s349_s20 = sshll.u32 %s347_s16, 4  ;;  %s350_s20 = int_to_ptr.hbm [resolvable:$true] %s349_s20 }
  0x30   : > { %s2066_s9 = sshra.s32 %s350_s20, 4  ;;  %s2067_s9 = int_to_ptr.hbm [resolvable:$true] %s2066_s9 }
  0x31   : > { %s2068_s22 = scalar_lea.hbm %s2067_s9, 8  ;;  %p2074_p0 = scmp.lt.s32.totalorder %s2067_s9, %s3435_s1 }
  0x32   : > { %p2069_p2 = scmp.ne.s32.totalorder %s2067_s9, %s2068_s22  ;;  %p2075_p3 = scmp.lt.s32.totalorder %s2073_s15, %s2068_s22 }
  0x34   : > { %p2071_p12 = pnand %p2070_p11, %p2069_p2  ;;  %p2076_p7 = por %p2075_p3, %p2074_p0 }
  0x36   : > { %p2072_p13 = pneg %p2071_p12 }
  0x38   : > { %p2077_p9 = pnand %p2076_p7, %p2072_p13 }
  0x3a   : > { %2080 = shalt.err (!%p2077_p9)
}
  0x3b   : > { %1937 = dma.hbm_to_vmem [thread:$0]  (!%p2351_p10), %s350_s20, 128, %s352_s19, %s339_s2  }
  0x3c   : > { %360 = sbr.rel (%p2315_p8) target bundleno = 970 (0x3ca), region = 60  ;;  %s2368_s29 = sand.u32 (!%p2315_p8), 1, %s2164_s24  }
  0x3d   : > { %s3413_s18 = sshll.u32 (!%p2315_p8), %s2368_s29, 3  ;;  %s363_s14 = scalar_lea.sflag (!%p2315_p8), [#allocation6], %s2368_s29 }
  0x3e   : > { %s2374_s9 = scalar_lea.vmem (!%p2315_p8), [#allocation5], %s3413_s18 }
  0x41   : > { %2143 = dma.done.wait (%p2302_p4), %s363_s14, 128  }
  0x42   : > { %2145 = vsyncadd (%p2302_p4), %s363_s14, 4294967168 }
  0x43   : > { %2147 = dma.done.wait (%p59_p1), [#allocation8], 32  }
  0x44   : > { %2149 = vsyncadd (%p59_p1), [#allocation8], 4294967264 }
  0x45   : > { %2151 = dma.done.wait (%p59_p1), [#allocation11], 64  }
  0x46   : > { %2153 = vsyncadd (%p59_p1), [#allocation11], 4294967232 }
  0x47   : > { %382 = sfence }
  0x48   : > { %s2389_s2 = sshll.u32 %s2293_s10, 7  ;;  %s3437_s3 = sld [smem:[#allocation22_spill]]  ;;  %v2180_v8 = vmov 4.0   ;;  %vm450_vm0 = vcmask 3072   ;;  %v2181_v37 = vmov 0   ;;  %v415_v60 = vld [vmem:[%s2374_s9] sm:$0xff] }
  0x49   : > { %s423_s27 = sadd.s32 1, %s2389_s2  ;;  %s432_s22 = sadd.s32 2, %s2389_s2  ;;  %2014 = vrcp.f32 %v2180_v8  ;;  %2012 = vset.pattern.permute.xlu1 %v2181_v37  ;;  %2013 = vset.pattern.permute.xlu0 %v2181_v37  ;;  %v2182_v56 = vmov 839922192   ;;  %vm3417_vm5 = vcmask 1043456   ;;  %vm545_vm6 = vcmask 1040384  }
  0x4a   : > { %s424_s13 = sld [smem:[#allocation9 + %s423_s27]]  ;;  %s441_s20 = sadd.s32 3, %s2389_s2  ;;  %v497_v57 = vunpack.c.l.s4 %v2182_v56  ;;  %vm548_vm7 = vcmask 1041408  }
  0x4b   : > { %s433_s19 = sld [smem:[#allocation9 + %s432_s22]]  ;;  %s2177_s12 = smov 127  }
  0x4c   : > { %s442_s21 = sld [smem:[#allocation9 + %s441_s20]]  ;;  %s2178_s16 = smov 125   ;;  %v498_v58 = vunpack.c.0.s8 %v497_v57 }
  0x4d   : > { %s2179_s14 = smov 126   ;;  %s419_s22 = sld [smem:[#allocation9 + %s2389_s2]] }
  0x4e   : > { %v416_v0 = vld [vmem:[%s3437_s3] sm:$0xf]  ;;  %s3438_s4 = sld [smem:[#allocation23_spill]]  ;;  %s2191_s30 = smov 14  }
  0x4f   : > { %v2015_v13 = vpop.eup %2014  ;;  %s3439_s5 = sld [smem:[#allocation24_spill]]  ;;  %s2192_s15 = smov 15  }
  0x50   : > { %v425_v1 = vstv %s424_s13  ;;  %v459_v15 = vmul.f32 4.0, %v2015_v13  ;;  %vm463_vm1 = vweird.f32 %v2015_v13  ;;  %s3440_s6 = sld [smem:[#allocation25_spill]]  ;;  %s3444_s1 = smov 110  }
  0x51   : > { %v426_v2 = vmul.f32 %v425_v1, %v416_v0  ;;  %v434_v4 = vstv %s433_s19  ;;  %s3441_s7 = sld [smem:[#allocation26_spill]]  ;;  %s2189_s19 = smov 18  }
  0x52   : > { %v443_v3 = vstv %s442_s21  ;;  %v435_v6 = vmul.f32 %v434_v4, %v416_v0  ;;  %v460_v19 = vsub.f32 1.0, %v459_v15  ;;  %s2190_s21 = smov 16   ;;  %s2512_s18 = sld [smem:[#allocation10 + $0x101]] }
  0x53   : > { %428 = vrot.lane.b32.xlu0 %v426_v2, %s2177_s12  ;;  %v444_v5 = vmul.f32 %v443_v3, %v416_v0  ;;  %v420_v7 = vstv %s419_s22  ;;  %s527_s22 = sld [smem:[#allocation3 + %s2389_s2]]  ;;  %s2183_s2 = smov 33  }
  0x54   : > { %v421_v9 = vmul.f32 %v420_v7, %v416_v0  ;;  %v417_v10 = vld [vmem:[%s3438_s4] sm:$0xf]  ;;  %v461_v23 = vmul.f32 %v2015_v13, %v460_v19  ;;  %s2571_s3 = sld [smem:[#allocation10 + $0x4]]  ;;  %s2203_s4 = smov 95  }
  0x55   : > { %446 = vrot.lane.b32.xlu1 %v444_v5, %s2178_s16  ;;  %v488_v51 = vld [vmem:[%s3439_s5] sm:$0xf]  ;;  %s525_s16 = sld [smem:[#allocation3 + %s423_s27]]  ;;  %s2184_s27 = smov 34  }
  0x56   : > { %v422_v12 = vadd.f32 %v421_v9, %v417_v10  ;;  %v462_v26 = vadd.f32 %v2015_v13, %v461_v23  ;;  %v490_v53 = vld [vmem:[%s3440_s6] sm:$0xf]  ;;  %s2629_s5 = sld [smem:[#allocation10 + $0x5]]  ;;  %s3451_s6 = smov 97  }
  0x57   : > { %v2422_v63 = vld [vmem:[%s3441_s7] sm:$0x3]  ;;  %s2678_s7 = sld [smem:[#allocation10 + $0x7]] }
  0x58   : > { %v464_v29 = vsel %vm463_vm1, %v2015_v13, %v462_v26  ;;  %v2427_v0 = vld [vmem:[%s3409_s8] sm:$0x3]  ;;  %vm551_vm8 = vcmp.ge.f32.partialorder %v2422_v63, 2.0  ;;  %vm553_vm11 = vcmp.ge.f32.partialorder %v2422_v63, 1.0  ;;  %s2688_s0 = sld [smem:[#allocation10 + $0x87]] }
  0x59   : > { %s528_s13 = scvt.s32.f32 %s527_s22  ;;  %s2186_s22 = smov 32   ;;  %vm552_vm9 = vcmp.ge.f32.partialorder %v2427_v0, 2.0 }
  0x5a   : > { %vm571_vm10 = vmand %vm552_vm9, %vm551_vm8 }
  0x5b   : > { %437 = vrot.lane.b32.xlu0 %v435_v6, %s2179_s14  ;;  %s526_s20 = scvt.s32.f32 %s525_s16  ;;  %v532_v2 = vstv %s528_s13  ;;  %s2185_s16 = smov 31   ;;  %vm616_vm15 = vmand %vm552_vm9, %vm553_vm11 }
  0x5c   : > { %v533_v10 = vsub.f32 %v532_v2, %v2427_v0  ;;  %s2188_s13 = smov 17  }
  0x5d   : > { %v529_v1 = vstv %s526_s20  ;;  %s2187_s20 = smov 30  }
  0x5e   : > { %v530_v7 = vsub.f32 %v529_v1, %v2422_v63 }
  0x60   : > { %v531_v13 = vmul.f32 0.03125, %v530_v7 }
  0x62   : > { %v536_v19 = vperm.slane %v531_v13, 0 }
  0xc5   : > { %v429_v11 = vpop.permute.xlu0 %428 }
  0xc6   : > { %v431_v14 = vadd.f32 %v429_v11, %v422_v12 }
  0xc7   : > { %v447_v17 = vpop.permute.xlu1 %446 }
  0xcd   : > { %v438_v16 = vpop.permute.xlu0 %437 }
  0xce   : > { %v440_v18 = vadd.f32 %v438_v16, %v431_v14  ;;  %v534_v16 = vmul.f32 0.03125, %v533_v10 }
  0xd0   : > { %v449_v20 = vadd.f32 %v447_v17, %v440_v18  ;;  %v541_v23 = vperm.slane %v534_v16, 0 }
  0xd2   : > { %v451_v21 = vsel %vm450_vm0, %v449_v20, 0.0 }
  0xd3   : > { %v452_v22 = vrot.slane %v451_v21, 4 }
  0xd5   : > { %v453_v24 = vadd.f32 %v452_v22, %v451_v21 }
  0xd7   : > { %v454_v25 = vrot.slane %v453_v24, 2 }
  0xd9   : > { %v455_v27 = vadd.f32 %v454_v25, %v453_v24  ;;  %v542_v24 = vperm.slane %v534_v16, 1 }
  0xdb   : > { %v456_v28 = vrot.slane %v455_v27, 1 }
  0xdd   : > { %v457_v30 = vadd.f32 %v456_v28, %v455_v27 }
  0xdf   : > { %v465_v31 = vmul.f32 %v464_v29, %v457_v30 }
  0xe1   : > { %v466_v32 = vsub.f32 %v449_v20, %v465_v31  ;;  %v537_v20 = vperm.slane %v531_v13, 1  ;;  %v566_v31 = vlaneseq }
  0xe3   : > { %v467_v33 = vmul.f32 %v466_v32, %v466_v32 }
  0xe5   : > { %v468_v34 = vsel %vm450_vm0, %v467_v33, 0.0  ;;  %v572_v33 = vsel %vm571_vm10, 1, %v2181_v37  ;;  %vm555_vm0 = vcmp.lt.f32.partialorder %v2422_v63, 15.0 }
  0xe6   : > { %v469_v35 = vrot.slane %v468_v34, 4  ;;  %vm2546_vm1 = vmand %vm552_vm9, %vm555_vm0 }
  0xe8   : > { %v470_v36 = vadd.f32 %v469_v35, %v468_v34  ;;  %v2495_v34 = vand.u32 127, %v566_v31  ;;  %v573_v35 = vperm.slane %v572_v33, 0 }
  0xea   : > { %v471_v38 = vrot.slane %v470_v36, 2  ;;  %vm568_vm12 = vcmp.lt.s32.totalorder %v2495_v34, 34  ;;  %vm575_vm13 = vcmp.eq.s32.totalorder %v573_v35, 1 }
  0xec   : > { %v472_v39 = vadd.f32 %v471_v38, %v470_v36  ;;  %v574_v36 = vperm.slane %v572_v33, 1 }
  0xee   : > { %v473_v40 = vrot.slane %v472_v39, 1  ;;  %vm576_vm14 = vcmp.eq.s32.totalorder %v574_v36, 1 }
  0xf0   : > { %v474_v41 = vadd.f32 %v473_v40, %v472_v39 }
  0xf2   : > { %v475_v42 = vmul.f32 %v474_v41, %v464_v29 }
  0xf4   : > { %v476_v43 = vadd.f32 1e-05, %v475_v42 }
  0xf6   : > { %2016 = vrsqrt.f32 %v476_v43  ;;  %vm483_vm3 = vweird.f32 %v476_v43 }
  0xfc   : > { %v2017_v44 = vpop.eup %2016 }
  0xfd   : > { %v478_v45 = vmul.f32 %v2017_v44, %v476_v43  ;;  %vm484_vm2 = vweird.f32 %v2017_v44 }
  0xfe   : > { %vm485_vm4 = vmor %vm483_vm3, %vm484_vm2  ;;  %vm557_vm2 = vcmp.lt.f32.partialorder %v2422_v63, 14.0  ;;  %vm613_vm3 = vcmp.lt.s32.totalorder %v2495_v34, 33 }
  0xff   : > { %v479_v46 = vmul.f32 %v2017_v44, %v478_v45 }
 0x101   : > { %v480_v47 = vmul.f32 0.5, %v479_v46 }
 0x103   : > { %v481_v48 = vsub.f32 1.5, %v480_v47 }
 0x105   : > { %v482_v49 = vmul.f32 %v2017_v44, %v481_v48 }
 0x107   : > { %v486_v50 = vsel %vm485_vm4, %v2017_v44, %v482_v49  ;;  %v617_v49 = vsel %vm616_vm15, 1, %v2181_v37  ;;  %vm750_vm4 = vmand %vm552_vm9, %vm557_vm2  ;;  %vm658_vm15 = vcmp.lt.s32.totalorder %v2495_v34, 32 }
 0x108   : > { %v487_v52 = vmul.f32 %v486_v50, %v466_v32 }
 0x10a   : > { %v489_v54 = vmul.f32 %v488_v51, %v487_v52 }
 0x10c   : > { %v491_v55 = vadd.f32 %v490_v53, %v489_v54 }
 0x10e   : > { %494 = vperm.xlu1 %2012, %v491_v55  }
 0x180   : > { %v495_v59 = vpop.permute.xlu1 %494 }
 0x181   : > { %v499_v61 = vperm.slane %v495_v59, %v498_v58 }
 0x183   : > { %v501_v62 = vmul.f32 %v499_v61, %v415_v60  ;;  %v618_v61 = vperm.slane %v617_v49, 0 }
 0x185   : > { %503 = vst [vmem:[#allocation1] ss:$2 sm:$0xff] %v501_v62  ;;  %v619_v62 = vperm.slane %v617_v49, 1 }
 0x187   : > { %vm2600_vm10 = vcmp.eq.s32.totalorder %v619_v62, 1 }
 0x18c   : > { %v504_v3 = vld.sshfl [vmem:[#allocation1] sm:$0xff pattern:$0x75316420]  ;;  %v505_v4 = vld.sshfl [vmem:[#allocation1 + $0x8] sm:$0xff pattern:$0x75316420] }
 0x18d   : > { %v509_v5 = vsel %vm3417_vm5, %v504_v3, 0.0  ;;  %v516_v6 = vsel %vm3417_vm5, %v505_v4, 0.0  ;;  %v706_v3 = vsel %vm2546_vm1, 1, %v2181_v37 }
 0x18e   : > { %v510_v8 = vrot.slane %v509_v5, 4  ;;  %v517_v9 = vrot.slane %v516_v6, 4  ;;  %v707_v16 = vperm.slane %v706_v3, 0 }
 0x190   : > { %v511_v11 = vadd.f32 %v510_v8, %v509_v5  ;;  %v518_v12 = vadd.f32 %v517_v9, %v516_v6  ;;  %v643_v8 = vstv %s2512_s18  ;;  %v661_v9 = vsel %vm552_vm9, 1, %v2181_v37  ;;  %s3460_s18 = smov 96  }
 0x191   : > { %vm702_vm9 = vcmp.lt.s32.totalorder %v2495_v34, 31 }
 0x192   : > { %v512_v14 = vrot.slane %v511_v11, 2  ;;  %v519_v15 = vrot.slane %v518_v12, 2 }
 0x194   : > { %v513_v17 = vadd.f32 %v512_v14, %v511_v11  ;;  %v520_v18 = vadd.f32 %v519_v15, %v518_v12 }
 0x196   : > { %v514_v21 = vrot.slane %v513_v17, 1  ;;  %v521_v22 = vrot.slane %v520_v18, 1 }
 0x198   : > { %v515_v25 = vadd.f32 %v514_v21, %v513_v17  ;;  %v522_v26 = vadd.f32 %v521_v22, %v520_v18 }
 0x19a   : > { %v546_v27 = vsel %vm545_vm6, %v515_v25, %v536_v19  ;;  %v547_v28 = vsel %vm545_vm6, %v522_v26, %v537_v20  ;;  %v708_v19 = vperm.slane %v706_v3, 1  ;;  %v2608_v20 = vsel %vm750_vm4, 1, %v2181_v37 }
 0x19b   : > { %v2435_v29 = vsel %vm548_vm7, %v546_v27, %v541_v23  ;;  %v2437_v30 = vsel %vm548_vm7, %v547_v28, %v542_v24  ;;  %vm2596_vm7 = vcmp.eq.s32.totalorder %v618_v61, 1  ;;  %v662_v23 = vperm.slane %v661_v9, 0 }
 0x19c   : > { %611 = vrot.lane.b32.xlu1 %v2437_v30, %s2183_s2  ;;  %609 = vrot.lane.b32.xlu0 %v2435_v29, %s2183_s2  ;;  %s2193_s2 = smov 2   ;;  %v663_v24 = vperm.slane %v661_v9, 1  ;;  %v752_v36 = vperm.slane %v2608_v20, 0  ;;  %vm2644_vm1 = vcmp.eq.s32.totalorder %v708_v19, 1 }
 0x19d   : > { %562 = vrot.lane.b32.xlu2 %v2435_v29, %s2184_s27  ;;  %vm2656_vm4 = vcmp.eq.s32.totalorder %v662_v23, 1 }
 0x19e   : > { %vm2660_vm5 = vcmp.eq.s32.totalorder %v663_v24, 1 }
 0x1a4   : > { %698 = vrot.lane.b32.xlu1 %v2435_v29, %s2185_s16  ;;  %656 = vrot.lane.b32.xlu0 %v2437_v30, %s2186_s22 }
 0x1a5   : > { %564 = vrot.lane.b32.xlu2 %v2437_v30, %s2184_s27  ;;  %s2194_s27 = smov 1  }
 0x1ac   : > { %745 = vrot.lane.b32.xlu1 %v2437_v30, %s2187_s20  ;;  %743 = vrot.lane.b32.xlu0 %v2435_v29, %s2187_s20  ;;  %s2197_s20 = smov 112  }
 0x1ad   : > { %654 = vrot.lane.b32.xlu2 %v2435_v29, %s2186_s22  ;;  %s2196_s22 = smov 114  }
 0x1b4   : > { %833 = vrot.lane.b32.xlu1 %v2435_v29, %s2188_s13  ;;  %790 = vrot.lane.b32.xlu0 %v2437_v30, %s2189_s19 }
 0x1b5   : > { %700 = vrot.lane.b32.xlu2 %v2437_v30, %s2185_s16  ;;  %s2195_s16 = smov 113  }
 0x1bc   : > { %880 = vrot.lane.b32.xlu1 %v2437_v30, %s2190_s21  ;;  %878 = vrot.lane.b32.xlu0 %v2435_v29, %s2190_s21  ;;  %s2491_s21 = sld [smem:[#allocation10 + $0x10c]] }
 0x1bd   : > { %788 = vrot.lane.b32.xlu2 %v2435_v29, %s2189_s19  ;;  %s2488_s19 = sld [smem:[#allocation10 + $0x8c]] }
 0x1c2   : > { %v1119_v41 = vstv %s2491_s21  ;;  %s3415_s21 = smov 96  }
 0x1c3   : > { %v1107_v38 = vstv %s2488_s19  ;;  %s2528_s19 = sld [smem:[#allocation10 + $0x103]]  ;;  %v2540_v51 = vmul.f32 %v1119_v41, %v2437_v30  ;;  %v2559_v56 = vmul.f32 %v1119_v41, %v2435_v29 }
 0x1c4   : > { %967 = vrot.lane.b32.xlu1 %v2435_v29, %s2191_s30  ;;  %924 = vrot.lane.b32.xlu0 %v2437_v30, %s2192_s15  ;;  %v2531_v48 = vmul.f32 %v1107_v38, %v2437_v30  ;;  %v2556_v55 = vmul.f32 %v1107_v38, %v2435_v29  ;;  %v753_v38 = vperm.slane %v2608_v20, 1 }
 0x1c5   : > { %835 = vrot.lane.b32.xlu2 %v2437_v30, %s2188_s13  ;;  %s2199_s13 = smov 111   ;;  %v1125_v4 = vrot.slane %v2540_v51, 2 }
 0x1c6   : > { %v1113_v1 = vrot.slane %v2531_v48, 1 }
 0x1c9   : > { %v732_v27 = vstv %s2528_s19  ;;  %s2816_s19 = sld [smem:[#allocation10 + $0x109]] }
 0x1cc   : > { %1014 = vrot.lane.b32.xlu1 %v2437_v30, %s2193_s2  ;;  %1012 = vrot.lane.b32.xlu0 %v2435_v29, %s2193_s2  ;;  %s2499_s2 = sld [smem:[#allocation4]] }
 0x1cd   : > { %922 = vrot.lane.b32.xlu2 %v2435_v29, %s2192_s15  ;;  %s2497_s15 = sld [smem:[#allocation10 + $0x80]] }
 0x1d2   : > { %v560_v60 = vstv %s2499_s2  ;;  %s2605_s2 = sld [smem:[#allocation10 + $0x6]] }
 0x1d3   : > { %v586_v45 = vstv %s2497_s15  ;;  %s2565_s15 = sld [smem:[#allocation10 + $0x102]] }
 0x1d4   : > { %1130 = vrot.lane.b32.xlu1 %v2435_v29, %s2177_s12  ;;  %1058 = vrot.lane.b32.xlu0 %v2437_v30, %s2194_s27 }
 0x1d5   : > { %969 = vrot.lane.b32.xlu2 %v2437_v30, %s2191_s30  ;;  %s2493_s30 = sld [smem:[#allocation10]] }
 0x1d9   : > { %v687_v35 = vstv %s2565_s15  ;;  %s3020_s15 = sld [smem:[#allocation10 + $0x10d]] }
 0x1db   : > { %v580_v42 = vstv %s2493_s30  ;;  %s3416_s30 = smov 97  }
 0x1dc   : > { %1176 = vrot.lane.b32.xlu1 %v2437_v30, %s2179_s14  ;;  %1174 = vrot.lane.b32.xlu0 %v2435_v29, %s2179_s14  ;;  %s3414_s14 = smov 110  }
 0x1dd   : > { %1056 = vrot.lane.b32.xlu2 %v2435_v29, %s2194_s27  ;;  %s2501_s27 = sld [smem:[#allocation10 + $0x100]] }
 0x1e3   : > { %v598_v2 = vstv %s2501_s27  ;;  %s2610_s27 = sld [smem:[#allocation10 + $0x86]] }
 0x1e4   : > { %1263 = vrot.lane.b32.xlu1 %v2435_v29, %s2195_s16  ;;  %1220 = vrot.lane.b32.xlu0 %v2437_v30, %s2196_s22 }
 0x1e5   : > { %1132 = vrot.lane.b32.xlu2 %v2437_v30, %s2177_s12  ;;  %s2486_s12 = sld [smem:[#allocation10 + $0xc]] }
 0x1eb   : > { %v1101_v40 = vstv %s2486_s12  ;;  %s2550_s12 = sld [smem:[#allocation10 + $0x82]] }
 0x1ec   : > { %1310 = vrot.lane.b32.xlu1 %v2437_v30, %s2197_s20  ;;  %1308 = vrot.lane.b32.xlu0 %v2435_v29, %s2197_s20  ;;  %s2510_s20 = sld [smem:[#allocation10 + $0x81]]  ;;  %v2537_v50 = vmul.f32 %v1101_v40, %v2437_v30  ;;  %v2553_v54 = vmul.f32 %v1101_v40, %v2435_v29 }
 0x1ed   : > { %1218 = vrot.lane.b32.xlu2 %v2435_v29, %s2196_s22  ;;  %s2506_s22 = sld [smem:[#allocation10 + $0x1]] }
 0x1f1   : > { %v675_v33 = vstv %s2550_s12  ;;  %s3009_s12 = sld [smem:[#allocation10 + $0x10a]] }
 0x1f2   : > { %v631_v7 = vstv %s2510_s20  ;;  %s2204_s20 = smov 94  }
 0x1f3   : > { %v625_v6 = vstv %s2506_s22  ;;  %s2698_s22 = sld [smem:[#allocation10 + $0x107]] }
 0x1f4   : > { %1397 = vrot.lane.b32.xlu1 %v2435_v29, %s3414_s14  ;;  %1354 = vrot.lane.b32.xlu0 %v2437_v30, %s2199_s13  ;;  %s2534_s14 = sld [smem:[#allocation10 + $0x2]] }
 0x1f5   : > { %1265 = vrot.lane.b32.xlu2 %v2437_v30, %s2195_s16  ;;  %s2200_s16 = smov 98  }
 0x1f7   : > { %v563_v32 = vpop.permute.xlu2 %562 }
 0x1fa   : > { %v669_v28 = vstv %s2534_s14  ;;  %s2782_s14 = sld [smem:[#allocation10 + $0x9]] }
 0x1fc   : > { %1444 = vrot.lane.b32.xlu1 %v2437_v30, %s2200_s16  ;;  %1442 = vrot.lane.b32.xlu0 %v2435_v29, %s2200_s16  ;;  %s2519_s16 = sld [smem:[#allocation10 + $0x3]] }
 0x1fd   : > { %1352 = vrot.lane.b32.xlu2 %v2435_v29, %s2199_s13  ;;  %s2525_s13 = sld [smem:[#allocation10 + $0x83]] }
 0x1ff   : > { %v565_v39 = vpop.permute.xlu2 %564 }
 0x200   : > { %v569_v43 = vsel %vm568_vm12, %v563_v32, %v565_v39  ;;  %v570_v44 = vsel %vm568_vm12, %v565_v39, %v563_v32  ;;  %vm554_vm12 = vcmp.ge.f32.partialorder %v2427_v0, 1.0 }
 0x201   : > { %v577_v46 = vsel %vm575_vm13, %v570_v44, 0.0  ;;  %v578_v47 = vsel %vm576_vm14, %v569_v43, 0.0  ;;  %vm2625_vm13 = vmand %vm554_vm12, %vm553_vm11  ;;  %vm2633_vm14 = vcmp.eq.s32.totalorder %v707_v16, 1  ;;  %v759_v44 = vstv %s2571_s3  ;;  %s2920_s3 = sld [smem:[#allocation10 + $0x8]] }
 0x202   : > { %v581_v52 = vmul.f32 %v580_v42, %v577_v46  ;;  %v582_v57 = vmul.f32 %v580_v42, %v578_v47  ;;  %v587_v58 = vmul.f32 %v586_v45, %v577_v46  ;;  %v588_v59 = vmul.f32 %v586_v45, %v578_v47 }
 0x203   : > { %v599_v17 = vmul.f32 %v598_v2, %v577_v46  ;;  %v600_v18 = vmul.f32 %v598_v2, %v578_v47  ;;  %v714_v21 = vstv %s2519_s16  ;;  %v720_v22 = vstv %s2525_s13  ;;  %s2808_s13 = sld [smem:[#allocation10 + $0x89]] }
 0x204   : > { %1532 = vrot.lane.b32.xlu1 %v2435_v29, %s3415_s21  ;;  %1489 = vrot.lane.b32.xlu0 %v2437_v30, %s3416_s30  ;;  %s2579_s21 = sld [smem:[#allocation10 + $0x84]]  ;;  %v583_v10 = vadd.f32 %v581_v52, %v560_v60  ;;  %v584_v11 = vadd.f32 %v582_v57, %v560_v60  ;;  %v591_v12 = vrot.slane %v587_v58, 1  ;;  %v592_v13 = vrot.slane %v588_v59, 1 }
 0x205   : > { %1399 = vrot.lane.b32.xlu2 %v2437_v30, %s3444_s1  ;;  %s2594_s1 = sld [smem:[#allocation10 + $0x104]]  ;;  %v603_v39 = vrot.slane %v599_v17, 2  ;;  %v604_v40 = vrot.slane %v600_v18, 2  ;;  %v2668_v58 = vsel %vm2625_vm13, 1, %v2181_v37  ;;  %v849_v17 = vstv %s2605_s2 }
 0x206   : > { %s2614_s30 = sld [smem:[#allocation10 + $0x106]]  ;;  %v595_v25 = vadd.f32 %v591_v12, %v583_v10  ;;  %v596_v26 = vadd.f32 %v592_v13, %v584_v11  ;;  %v842_v13 = vperm.slane %v2668_v58, 0  ;;  %v855_v18 = vstv %s2610_s27 }
 0x207   : > { %v2582_v5 = vpop.permute.xlu2 %654  ;;  %vm2713_vm13 = vcmp.eq.s32.totalorder %v753_v38, 1  ;;  %v2723_v31 = vsel %vm554_vm12, 1, %v2181_v37  ;;  %s2942_s16 = sld [smem:[#allocation10 + $0x108]] }
 0x208   : > { %v607_v59 = vadd.f32 %v603_v39, %v595_v25  ;;  %v608_v60 = vadd.f32 %v604_v40, %v596_v26  ;;  %v804_v26 = vstv %s2629_s5  ;;  %s2922_s5 = sld [smem:[#allocation10 + $0x88]] }
 0x209   : > { %s3037_s2 = sld [smem:[#allocation10 + $0x8b]] }
 0x20a   : > { %v765_v45 = vstv %s2579_s21  ;;  %s3015_s21 = sld [smem:[#allocation10 + $0xd]] }
 0x20b   : > { %v777_v57 = vstv %s2594_s1  ;;  %s3035_s1 = sld [smem:[#allocation10 + $0xb]] }
 0x20c   : > { %1578 = vrot.lane.b32.xlu1 %v2437_v30, %s2203_s4  ;;  %1576 = vrot.lane.b32.xlu0 %v2435_v29, %s2203_s4  ;;  %s2642_s4 = sld [smem:[#allocation10 + $0x85]]  ;;  %v867_v19 = vstv %s2614_s30 }
 0x20d   : > { %1487 = vrot.lane.b32.xlu2 %v2435_v29, %s3451_s6  ;;  %s2650_s6 = sld [smem:[#allocation10 + $0x105]] }
 0x20e   : > { %v612_v41 = vpop.permute.xlu1 %611  ;;  %v610_v42 = vpop.permute.xlu0 %609  ;;  %s3017_s30 = sld [smem:[#allocation10 + $0x8d]] }
 0x20f   : > { %v614_v46 = vsel %vm613_vm3, %v610_v42, %v612_v41  ;;  %v615_v47 = vsel %vm613_vm3, %v612_v41, %v610_v42  ;;  %v701_v49 = vpop.permute.xlu2 %700  ;;  %vm795_vm3 = vmand %vm554_vm12, %vm551_vm8  ;;  %s3045_s27 = sld [smem:[#allocation10 + $0x10b]] }
 0x210   : > { %v622_v61 = vsel %vm2596_vm7, %v615_v47, 0.0  ;;  %v623_v62 = vsel %vm2600_vm10, %v614_v46, 0.0  ;;  %v2696_v14 = vsel %vm795_vm3, 1, %v2181_v37  ;;  %vm747_vm7 = vcmp.lt.s32.totalorder %v2495_v34, 30  ;;  %vm974_vm3 = vmand %vm554_vm12, %vm557_vm2 }
 0x211   : > { %v626_v2 = vmul.f32 %v625_v6, %v622_v61  ;;  %v627_v3 = vmul.f32 %v625_v6, %v623_v62  ;;  %v632_v9 = vmul.f32 %v631_v7, %v622_v61  ;;  %v633_v10 = vmul.f32 %v631_v7, %v623_v62 }
 0x212   : > { %v644_v11 = vmul.f32 %v643_v8, %v622_v61  ;;  %v645_v12 = vmul.f32 %v643_v8, %v623_v62  ;;  %v843_v8 = vperm.slane %v2668_v58, 1  ;;  %vm2709_vm10 = vcmp.eq.s32.totalorder %v752_v36, 1 }
 0x213   : > { %v628_v6 = vadd.f32 %v626_v2, %v607_v59  ;;  %v629_v15 = vadd.f32 %v627_v3, %v608_v60  ;;  %v636_v16 = vrot.slane %v632_v9, 1  ;;  %v637_v7 = vrot.slane %v633_v10, 1 }
 0x214   : > { %1623 = vrot.lane.b32.xlu0 %v2437_v30, %s2204_s20  ;;  %v797_v24 = vperm.slane %v2696_v14, 0  ;;  %v798_v25 = vperm.slane %v2696_v14, 1  ;;  %v810_v38 = vstv %s2642_s4  ;;  %v822_v41 = vstv %s2650_s6  ;;  %s3073_s4 = sld [smem:[#allocation10 + $0xe]] }
 0x215   : > { %1534 = vrot.lane.b32.xlu2 %v2437_v30, %s3460_s18  ;;  %v640_v39 = vadd.f32 %v636_v16, %v628_v6  ;;  %v648_v30 = vrot.slane %v644_v11, 2  ;;  %v641_v42 = vadd.f32 %v637_v7, %v629_v15  ;;  %v649_v46 = vrot.slane %v645_v12, 2  ;;  %s3081_s6 = sld [smem:[#allocation10 + $0x8e]] }
 0x216   : > { %v699_v36 = vpop.permute.xlu1 %698  ;;  %v657_v40 = vpop.permute.xlu0 %656  ;;  %v887_v2 = vperm.slane %v2723_v31, 1  ;;  %v893_v3 = vstv %s2678_s7  ;;  %v899_v9 = vstv %s2688_s0  ;;  %v911_v12 = vstv %s2698_s22  ;;  %s2989_s7 = sld [smem:[#allocation10 + $0xa]] }
 0x217   : > { %v703_v47 = vsel %vm702_vm9, %v699_v36, %v701_v49  ;;  %v704_v58 = vsel %vm702_vm9, %v701_v49, %v699_v36  ;;  %v659_v60 = vsel %vm658_vm15, %v2582_v5, %v657_v40  ;;  %v660_v61 = vsel %vm658_vm15, %v657_v40, %v2582_v5  ;;  %v2739_v62 = vpop.permute.xlu2 %788  ;;  %s3005_s0 = sld [smem:[#allocation10 + $0x8a]] }
 0x218   : > { %v711_v59 = vsel %vm2633_vm14, %v704_v58, 0.0  ;;  %v886_v49 = vperm.slane %v2723_v31, 0  ;;  %v712_v32 = vsel %vm2644_vm1, %v703_v47, 0.0  ;;  %v652_v10 = vadd.f32 %v648_v30, %v640_v39  ;;  %s3083_s22 = sld [smem:[#allocation10 + $0x10e]] }
 0x219   : > { %v666_v11 = vsel %vm2656_vm4, %v660_v61, 0.0  ;;  %v667_v5 = vsel %vm2660_vm5, %v659_v60, 0.0  ;;  %v653_v14 = vadd.f32 %v649_v46, %v641_v42  ;;  %v715_v6 = vmul.f32 %v714_v21, %v711_v59  ;;  %s3269_s18 = sld [smem:[#allocation10 + $0x96]] }
 0x21a   : > { %v670_v43 = vmul.f32 %v669_v28, %v666_v11  ;;  %v671_v15 = vmul.f32 %v669_v28, %v667_v5  ;;  %v721_v16 = vmul.f32 %v720_v22, %v711_v59  ;;  %v722_v52 = vmul.f32 %v720_v22, %v712_v32 }
 0x21b   : > { %v676_v7 = vmul.f32 %v675_v33, %v666_v11  ;;  %v677_v53 = vmul.f32 %v675_v33, %v667_v5  ;;  %vm837_vm5 = vcmp.lt.s32.totalorder %v2495_v34, 17  ;;  %vm792_vm9 = vcmp.lt.s32.totalorder %v2495_v34, 18 }
 0x21c   : > { %v672_v39 = vadd.f32 %v670_v43, %v652_v10  ;;  %v673_v30 = vadd.f32 %v671_v15, %v653_v14  ;;  %v688_v36 = vmul.f32 %v687_v35, %v666_v11  ;;  %v689_v40 = vmul.f32 %v687_v35, %v667_v5 }
 0x21d   : > { %1621 = vrot.lane.b32.xlu2 %v2435_v29, %s2204_s20  ;;  %vm2774_vm14 = vcmp.eq.s32.totalorder %v842_v13, 1  ;;  %vm2778_vm15 = vcmp.eq.s32.totalorder %v843_v8, 1  ;;  %v733_v33 = vmul.f32 %v732_v27, %v711_v59  ;;  %v734_v42 = vmul.f32 %v732_v27, %v712_v32  ;;  %s3091_s20 = sld [smem:[#allocation10 + $0x10]] }
 0x21e   : > { %v680_v46 = vrot.slane %v676_v7, 1  ;;  %v681_v35 = vrot.slane %v677_v53, 1  ;;  %v746_v47 = vpop.permute.xlu1 %745  ;;  %v744_v29 = vpop.permute.xlu0 %743  ;;  %v692_v13 = vrot.slane %v688_v36, 2  ;;  %v693_v58 = vrot.slane %v689_v40, 2 }
 0x21f   : > { %v748_v8 = vsel %vm747_vm7, %v744_v29, %v746_v47  ;;  %v749_v60 = vsel %vm747_vm7, %v746_v47, %v744_v29  ;;  %vm2796_vm1 = vcmp.eq.s32.totalorder %v797_v24, 1  ;;  %vm2800_vm4 = vcmp.eq.s32.totalorder %v798_v25, 1  ;;  %v836_v53 = vpop.permute.xlu2 %835 }
 0x220   : > { %v684_v61 = vadd.f32 %v680_v46, %v672_v39  ;;  %v685_v59 = vadd.f32 %v681_v35, %v673_v30  ;;  %v756_v27 = vsel %vm2709_vm10, %v749_v60, 0.0  ;;  %v757_v10 = vsel %vm2713_vm13, %v748_v8, 0.0 }
 0x221   : > { %v716_v20 = vmul.f32 %v714_v21, %v712_v32  ;;  %v725_v23 = vrot.slane %v721_v16, 1  ;;  %v766_v24 = vmul.f32 %v765_v45, %v756_v27  ;;  %v767_v14 = vmul.f32 %v765_v45, %v757_v10 }
 0x222   : > { %v696_v25 = vadd.f32 %v692_v13, %v684_v61  ;;  %v697_v43 = vadd.f32 %v693_v58, %v685_v59  ;;  %v778_v15 = vmul.f32 %v777_v57, %v756_v27  ;;  %v779_v7 = vmul.f32 %v777_v57, %v757_v10 }
 0x223   : > { %v726_v39 = vrot.slane %v722_v52, 1  ;;  %v737_v30 = vrot.slane %v733_v33, 2  ;;  %v738_v21 = vrot.slane %v734_v42, 2  ;;  %v2823_v32 = vsel %vm974_vm3, 1, %v2181_v37  ;;  %vm929_vm3 = vmand %vm554_vm12, %vm555_vm0 }
 0x224   : > { %v717_v16 = vadd.f32 %v715_v6, %v696_v25  ;;  %v718_v36 = vadd.f32 %v716_v20, %v697_v43  ;;  %v760_v45 = vmul.f32 %v759_v44, %v756_v27  ;;  %v761_v40 = vmul.f32 %v759_v44, %v757_v10 }
 0x225   : > { %vm882_vm7 = vcmp.lt.s32.totalorder %v2495_v34, 16  ;;  %v770_v46 = vrot.slane %v766_v24, 1  ;;  %v771_v35 = vrot.slane %v767_v14, 1  ;;  %v782_v47 = vrot.slane %v778_v15, 2 }
 0x226   : > { %v983_v29 = vstv %s2782_s14  ;;  %v729_v57 = vadd.f32 %v725_v23, %v717_v16  ;;  %v730_v13 = vadd.f32 %v726_v39, %v718_v36  ;;  %v783_v52 = vrot.slane %v779_v7, 2  ;;  %v834_v33 = vpop.permute.xlu1 %833  ;;  %v791_v42 = vpop.permute.xlu0 %790  ;;  %s3273_s14 = sld [smem:[#allocation10 + $0x116]] }
 0x227   : > { %vm2833_vm10 = vcmp.eq.s32.totalorder %v886_v49, 1  ;;  %vm2839_vm13 = vcmp.eq.s32.totalorder %v887_v2, 1  ;;  %v976_v58 = vperm.slane %v2823_v32, 0  ;;  %v838_v49 = vsel %vm837_vm5, %v834_v33, %v836_v53 }
 0x228   : > { %v839_v31 = vsel %vm837_vm5, %v836_v53, %v834_v33  ;;  %v793_v2 = vsel %vm792_vm9, %v2739_v62, %v791_v42  ;;  %v794_v8 = vsel %vm792_vm9, %v791_v42, %v2739_v62  ;;  %v741_v0 = vadd.f32 %v737_v30, %v729_v57  ;;  %v2892_v30 = vpop.permute.xlu2 %922 }
 0x229   : > { %v742_v60 = vadd.f32 %v738_v21, %v730_v13  ;;  %v846_v61 = vsel %vm2774_vm14, %v839_v31, 0.0  ;;  %v847_v59 = vsel %vm2778_vm15, %v838_v49, 0.0  ;;  %v977_v27 = vperm.slane %v2823_v32, 1 }
 0x22a   : > { %v989_v10 = vstv %s2808_s13  ;;  %v1001_v20 = vstv %s2816_s19  ;;  %v2866_v23 = vsel %vm929_vm3, 1, %v2181_v37  ;;  %v762_v62 = vadd.f32 %v760_v45, %v741_v0  ;;  %s3104_s13 = sld [smem:[#allocation10 + $0x90]] }
 0x22b   : > { %v763_v24 = vadd.f32 %v761_v40, %v742_v60  ;;  %v850_v28 = vmul.f32 %v849_v17, %v846_v61  ;;  %v851_v22 = vmul.f32 %v849_v17, %v847_v59  ;;  %v2874_v14 = vmul.f32 %v855_v18, %v846_v61  ;;  %s3114_s19 = sld [smem:[#allocation10 + $0x110]] }
 0x22c   : > { %v2878_v25 = vmul.f32 %v855_v18, %v847_v59  ;;  %v801_v43 = vsel %vm2796_vm1, %v794_v8, 0.0  ;;  %v802_v15 = vsel %vm2800_vm4, %v793_v2, 0.0  ;;  %v774_v7 = vadd.f32 %v770_v46, %v762_v62 }
 0x22d   : > { %v775_v53 = vadd.f32 %v771_v35, %v763_v24  ;;  %v2886_v39 = vmul.f32 %v867_v19, %v846_v61  ;;  %v2890_v17 = vmul.f32 %v867_v19, %v847_v59  ;;  %vm971_vm12 = vcmp.lt.s32.totalorder %v2495_v34, 14 }
 0x22e   : > { %v805_v18 = vmul.f32 %v804_v26, %v801_v43  ;;  %v806_v11 = vmul.f32 %v804_v26, %v802_v15  ;;  %v811_v21 = vmul.f32 %v810_v38, %v801_v43  ;;  %v812_v5 = vmul.f32 %v810_v38, %v802_v15  ;;  %v881_v19 = vpop.permute.xlu1 %880  ;;  %v879_v46 = vpop.permute.xlu0 %878 }
 0x22f   : > { %v786_v16 = vadd.f32 %v782_v47, %v774_v7  ;;  %v787_v36 = vadd.f32 %v783_v52, %v775_v53  ;;  %v823_v45 = vmul.f32 %v822_v41, %v801_v43  ;;  %v824_v40 = vmul.f32 %v822_v41, %v802_v15 }
 0x230   : > { %v860_v35 = vrot.slane %v2874_v14, 1  ;;  %v861_v57 = vrot.slane %v2878_v25, 1  ;;  %v883_v13 = vsel %vm882_vm7, %v879_v46, %v881_v19  ;;  %v884_v26 = vsel %vm882_vm7, %v881_v19, %v879_v46 }
 0x231   : > { %v807_v38 = vadd.f32 %v805_v18, %v786_v16  ;;  %v808_v47 = vadd.f32 %v806_v11, %v787_v36  ;;  %v815_v52 = vrot.slane %v811_v21, 1  ;;  %v816_v41 = vrot.slane %v812_v5, 1 }
 0x232   : > { %vm926_vm5 = vcmp.lt.s32.totalorder %v2495_v34, 15  ;;  %v872_v33 = vrot.slane %v2886_v39, 2  ;;  %v873_v42 = vrot.slane %v2890_v17, 2  ;;  %v890_v49 = vsel %vm2833_vm10, %v884_v26, 0.0 }
 0x233   : > { %v891_v31 = vsel %vm2839_vm13, %v883_v13, 0.0  ;;  %v819_v2 = vadd.f32 %v815_v52, %v807_v38  ;;  %v820_v8 = vadd.f32 %v816_v41, %v808_v47  ;;  %v827_v0 = vrot.slane %v823_v45, 2 }
 0x234   : > { %v828_v60 = vrot.slane %v824_v40, 2  ;;  %v900_v61 = vmul.f32 %v899_v9, %v890_v49  ;;  %v901_v59 = vmul.f32 %v899_v9, %v891_v31  ;;  %v912_v6 = vmul.f32 %v911_v12, %v890_v49 }
 0x235   : > { %v913_v62 = vmul.f32 %v911_v12, %v891_v31  ;;  %v831_v44 = vadd.f32 %v827_v0, %v819_v2  ;;  %vm2934_vm9 = vcmp.eq.s32.totalorder %v976_v58, 1  ;;  %vm2938_vm14 = vcmp.eq.s32.totalorder %v977_v27, 1  ;;  %v970_v27 = vpop.permute.xlu2 %969 }
 0x236   : > { %v832_v24 = vadd.f32 %v828_v60, %v820_v8  ;;  %v894_v9 = vmul.f32 %v893_v3, %v890_v49  ;;  %v895_v43 = vmul.f32 %v893_v3, %v891_v31  ;;  %v931_v12 = vperm.slane %v2866_v23, 0  ;;  %v968_v39 = vpop.permute.xlu1 %967 }
 0x237   : > { %v932_v15 = vperm.slane %v2866_v23, 1  ;;  %v852_v32 = vadd.f32 %v850_v28, %v831_v44  ;;  %v904_v7 = vrot.slane %v900_v61, 1  ;;  %v905_v53 = vrot.slane %v901_v59, 1  ;;  %v925_v28 = vpop.permute.xlu0 %924 }
 0x238   : > { %v853_v58 = vadd.f32 %v851_v22, %v832_v24  ;;  %v916_v17 = vrot.slane %v912_v6, 2  ;;  %v917_v18 = vrot.slane %v913_v62, 2  ;;  %v972_v3 = vsel %vm971_vm12, %v968_v39, %v970_v27 }
 0x239   : > { %v973_v23 = vsel %vm971_vm12, %v970_v27, %v968_v39  ;;  %v864_v22 = vadd.f32 %v860_v35, %v852_v32  ;;  %v981_v5 = vsel %vm2938_vm14, %v972_v3, 0.0  ;;  %vm2962_vm15 = vcmp.eq.s32.totalorder %v931_v12, 1 }
 0x23a   : > { %v865_v11 = vadd.f32 %v861_v57, %v853_v58  ;;  %v980_v21 = vsel %vm2934_vm9, %v973_v23, 0.0  ;;  %vm2966_vm1 = vcmp.eq.s32.totalorder %v932_v15, 1  ;;  %v938_v40 = vstv %s2920_s3  ;;  %s3126_s3 = sld [smem:[#allocation10 + $0xf]] }
 0x23b   : > { %v2960_v16 = vmul.f32 %v989_v10, %v980_v21  ;;  %v876_v19 = vadd.f32 %v872_v33, %v864_v22  ;;  %v2973_v35 = vmul.f32 %v983_v29, %v980_v21  ;;  %v944_v57 = vstv %s2922_s5  ;;  %s3128_s5 = sld [smem:[#allocation10 + $0x8f]] }
 0x23c   : > { %v877_v46 = vadd.f32 %v873_v42, %v865_v11  ;;  %v985_v13 = vmul.f32 %v983_v29, %v981_v5  ;;  %v2980_v26 = vmul.f32 %v989_v10, %v981_v5  ;;  %v2984_v38 = vmul.f32 %v1001_v20, %v980_v21 }
 0x23d   : > { %v927_v47 = vsel %vm926_vm5, %v2892_v30, %v925_v28  ;;  %v896_v52 = vadd.f32 %v894_v9, %v876_v19  ;;  %v2993_v33 = vmul.f32 %v1001_v20, %v981_v5  ;;  %v956_v42 = vstv %s2942_s16  ;;  %v3011_v14 = vpop.permute.xlu2 %1056  ;;  %s3140_s16 = sld [smem:[#allocation10 + $0x10f]] }
 0x23e   : > { %v897_v41 = vadd.f32 %v895_v43, %v877_v46  ;;  %v994_v29 = vrot.slane %v2960_v16, 1  ;;  %v928_v10 = vsel %vm926_vm5, %v925_v28, %v2892_v30  ;;  %v936_v49 = vsel %vm2966_vm1, %v927_v47, 0.0  ;;  %v1015_v60 = vpop.permute.xlu1 %1014 }
 0x23f   : > { %v1019_v31 = vsel %vm551_vm8, 1, %v2181_v37  ;;  %v908_v2 = vadd.f32 %v904_v7, %v896_v52  ;;  %v935_v20 = vsel %vm2962_vm15, %v928_v10, 0.0  ;;  %v940_v0 = vmul.f32 %v938_v40, %v936_v49  ;;  %v1013_v15 = vpop.permute.xlu0 %1012 }
 0x240   : > { %v909_v8 = vadd.f32 %v905_v53, %v897_v41  ;;  %v939_v61 = vmul.f32 %v938_v40, %v935_v20  ;;  %v945_v30 = vmul.f32 %v944_v57, %v935_v20  ;;  %v946_v59 = vmul.f32 %v944_v57, %v936_v49 }
 0x241   : > { %v957_v6 = vmul.f32 %v956_v42, %v935_v20  ;;  %v920_v62 = vadd.f32 %v916_v17, %v908_v2  ;;  %v958_v24 = vmul.f32 %v956_v42, %v936_v49  ;;  %v1020_v25 = vperm.slane %v1019_v31, 0 }
 0x242   : > { %v921_v44 = vadd.f32 %v917_v18, %v909_v8  ;;  %v995_v9 = vrot.slane %v2980_v26, 1  ;;  %v949_v43 = vrot.slane %v945_v30, 1  ;;  %vm1016_vm4 = vcmp.lt.s32.totalorder %v2495_v34, 2 }
 0x243   : > { %v1021_v12 = vperm.slane %v1019_v31, 1  ;;  %v941_v32 = vadd.f32 %v939_v61, %v920_v62  ;;  %v950_v7 = vrot.slane %v946_v59, 1  ;;  %vm1022_vm7 = vcmp.eq.s32.totalorder %v1020_v25, 1 }
 0x244   : > { %v942_v58 = vadd.f32 %v940_v0, %v921_v44  ;;  %v961_v53 = vrot.slane %v957_v6, 2  ;;  %v962_v27 = vrot.slane %v958_v24, 2  ;;  %v1027_v39 = vstv %s2989_s7  ;;  %s3169_s7 = sld [smem:[#allocation10 + $0x91]] }
 0x245   : > { %vm1023_vm10 = vcmp.eq.s32.totalorder %v1021_v12, 1  ;;  %v953_v17 = vadd.f32 %v949_v43, %v941_v32  ;;  %v1017_v3 = vsel %vm1016_vm4, %v1013_v15, %v1015_v60  ;;  %v1018_v23 = vsel %vm1016_vm4, %v1015_v60, %v1013_v15 }
 0x246   : > { %v954_v18 = vadd.f32 %v950_v7, %v942_v58  ;;  %v1006_v28 = vrot.slane %v2984_v38, 2  ;;  %v1024_v22 = vsel %vm1022_vm7, %v1018_v23, 0.0  ;;  %v1025_v11 = vsel %vm1023_vm10, %v1017_v3, 0.0  ;;  %v1131_v41 = vpop.permute.xlu1 %1130 }
 0x247   : > { %v1137_v21 = vsel %vm555_vm0, 1, %v2181_v37  ;;  %v965_v5 = vadd.f32 %v961_v53, %v953_v17  ;;  %v1033_v45 = vstv %s3005_s0  ;;  %v1045_v40 = vstv %s3009_s12  ;;  %v1059_v62 = vpop.permute.xlu0 %1058  ;;  %s3175_s0 = sld [smem:[#allocation10 + $0x11]] }
 0x248   : > { %v966_v36 = vadd.f32 %v962_v27, %v954_v18  ;;  %v1007_v19 = vrot.slane %v2993_v33, 2  ;;  %v1028_v46 = vmul.f32 %v1027_v39, %v1024_v22  ;;  %v1029_v57 = vmul.f32 %v1027_v39, %v1025_v11  ;;  %s3177_s12 = sld [smem:[#allocation10 + $0x111]] }
 0x249   : > { %vm1134_vm13 = vcmp.lt.s32.totalorder %v2495_v34, 127  ;;  %v986_v26 = vadd.f32 %v2973_v35, %v965_v5  ;;  %v1138_v38 = vperm.slane %v1137_v21, 0  ;;  %v1139_v52 = vperm.slane %v1137_v21, 1  ;;  %v1133_v35 = vpop.permute.xlu2 %1132 }
 0x24a   : > { %v987_v47 = vadd.f32 %v985_v13, %v966_v36  ;;  %v1034_v42 = vmul.f32 %v1033_v45, %v1024_v22  ;;  %v1035_v10 = vmul.f32 %v1033_v45, %v1025_v11  ;;  %v1046_v49 = vmul.f32 %v1045_v40, %v1024_v22 }
 0x24b   : > { %v1047_v31 = vmul.f32 %v1045_v40, %v1025_v11  ;;  %v998_v33 = vadd.f32 %v994_v29, %v986_v26  ;;  %vm1140_vm3 = vcmp.eq.s32.totalorder %v1138_v38, 1  ;;  %vm3041_vm12 = vcmp.eq.s32.totalorder %v1139_v52, 1 }
 0x24c   : > { %v999_v2 = vadd.f32 %v995_v9, %v987_v47  ;;  %v1145_v8 = vstv %s3015_s21  ;;  %v1151_v20 = vstv %s3017_s30  ;;  %v1163_v0 = vstv %s3020_s15  ;;  %s3189_s21 = sld [smem:[#allocation10 + $0x13]] }
 0x24d   : > { %v1135_v60 = vsel %vm1134_vm13, %v1131_v41, %v1133_v35  ;;  %v1010_v61 = vadd.f32 %v1006_v28, %v998_v33  ;;  %v1136_v16 = vsel %vm1134_vm13, %v1133_v35, %v1131_v41  ;;  %v1038_v59 = vrot.slane %v1034_v42, 1  ;;  %s3195_s30 = sld [smem:[#allocation10 + $0x93]] }
 0x24e   : > { %v1011_v30 = vadd.f32 %v1007_v19, %v999_v2  ;;  %v1142_v29 = vsel %vm1140_vm3, %v1135_v60, 0.0  ;;  %v1039_v6 = vrot.slane %v1035_v10, 1  ;;  %v1112_v44 = vrot.slane %v2556_v55, 1  ;;  %v1177_v19 = vpop.permute.xlu1 %1176  ;;  %s3201_s15 = sld [smem:[#allocation10 + $0x113]] }
 0x24f   : > { %v1124_v24 = vrot.slane %v2559_v56, 2  ;;  %v1030_v25 = vadd.f32 %v1028_v46, %v1010_v61  ;;  %v1050_v43 = vrot.slane %v1046_v49, 2  ;;  %v1143_v12 = vsel %vm3041_vm12, %v1136_v16, 0.0  ;;  %v1175_v35 = vpop.permute.xlu0 %1174 }
 0x250   : > { %v1031_v9 = vadd.f32 %v1029_v57, %v1011_v30  ;;  %v1051_v15 = vrot.slane %v1047_v31, 2  ;;  %v3058_v32 = vmul.f32 %v1145_v8, %v1142_v29  ;;  %v3060_v58 = vmul.f32 %v1151_v20, %v1142_v29 }
 0x251   : > { %v3062_v7 = vmul.f32 %v1163_v0, %v1142_v29  ;;  %v1042_v53 = vadd.f32 %v1038_v59, %v1030_v25  ;;  %vm1060_vm5 = vcmp.lt.s32.totalorder %v2495_v34, 1  ;;  %v1063_v39 = vsel %vm553_vm11, 1, %v2181_v37 }
 0x252   : > { %v1043_v27 = vadd.f32 %v1039_v6, %v1031_v9  ;;  %v3068_v17 = vmul.f32 %v1145_v8, %v1143_v12  ;;  %v1064_v18 = vperm.slane %v1063_v39, 0  ;;  %v1065_v3 = vperm.slane %v1063_v39, 1 }
 0x253   : > { %v1071_v23 = vstv %s3035_s1  ;;  %v1054_v28 = vadd.f32 %v1050_v43, %v1042_v53  ;;  %v1077_v11 = vstv %s3037_s2  ;;  %v1089_v21 = vstv %s3045_s27  ;;  %s3206_s1 = sld [smem:[#allocation10 + $0x12]] }
 0x254   : > { %v1055_v22 = vadd.f32 %v1051_v15, %v1043_v27  ;;  %vm1066_vm9 = vcmp.eq.s32.totalorder %v1064_v18, 1  ;;  %vm1067_vm14 = vcmp.eq.s32.totalorder %v1065_v3, 1  ;;  %v1061_v5 = vsel %vm1060_vm5, %v3011_v14, %v1059_v62  ;;  %s3216_s2 = sld [smem:[#allocation10 + $0x92]] }
 0x255   : > { %v1062_v36 = vsel %vm1060_vm5, %v1059_v62, %v3011_v14  ;;  %v1069_v40 = vsel %vm1067_vm14, %v1061_v5, 0.0  ;;  %vm1178_vm15 = vcmp.lt.s32.totalorder %v2495_v34, 126  ;;  %v1181_v46 = vsel %vm557_vm2, 1, %v2181_v37  ;;  %v3085_v14 = vpop.permute.xlu2 %1218  ;;  %s3218_s27 = sld [smem:[#allocation10 + $0x112]] }
 0x256   : > { %v1068_v45 = vsel %vm1066_vm9, %v1062_v36, 0.0  ;;  %v1073_v26 = vmul.f32 %v1071_v23, %v1069_v40  ;;  %v1079_v38 = vmul.f32 %v1077_v11, %v1069_v40  ;;  %v1091_v41 = vmul.f32 %v1089_v21, %v1069_v40 }
 0x257   : > { %v1072_v57 = vmul.f32 %v1071_v23, %v1068_v45  ;;  %v1078_v47 = vmul.f32 %v1077_v11, %v1068_v45  ;;  %v1090_v52 = vmul.f32 %v1089_v21, %v1068_v45  ;;  %v1182_v42 = vperm.slane %v1181_v46, 0 }
 0x258   : > { %v1183_v10 = vperm.slane %v1181_v46, 1  ;;  %v1075_v31 = vadd.f32 %v1073_v26, %v1055_v22  ;;  %v1083_v2 = vrot.slane %v1079_v38, 1  ;;  %v3087_v13 = vmul.f32 %v1151_v20, %v1143_v12  ;;  %v3101_v20 = vld [vmem:[%s3409_s8] sm:$0x3]  ;;  %v1264_v22 = vpop.permute.xlu1 %1263 }
 0x259   : > { %v1074_v49 = vadd.f32 %v1072_v57, %v1054_v28  ;;  %v1082_v33 = vrot.slane %v1078_v47, 1  ;;  %v3089_v8 = vmul.f32 %v1163_v0, %v1143_v12  ;;  %vm1184_vm1 = vcmp.eq.s32.totalorder %v1182_v42, 1 }
 0x25a   : > { %vm1185_vm4 = vcmp.eq.s32.totalorder %v1183_v10, 1  ;;  %v1087_v61 = vadd.f32 %v1083_v2, %v1075_v31  ;;  %v1094_v30 = vrot.slane %v1090_v52, 2  ;;  %v1095_v16 = vrot.slane %v1091_v41, 2  ;;  %v1221_v52 = vpop.permute.xlu0 %1220 }
 0x25b   : > { %v1086_v60 = vadd.f32 %v1082_v33, %v1074_v49  ;;  %v1189_v29 = vstv %s3073_s4  ;;  %v1179_v59 = vsel %vm1178_vm15, %v1175_v35, %v1177_v19  ;;  %v1180_v6 = vsel %vm1178_vm15, %v1177_v19, %v1175_v35  ;;  %s3237_s4 = sld [smem:[#allocation10 + $0x94]] }
 0x25c   : > { %vm556_vm7 = vcmp.lt.f32.partialorder %v3101_v20, 15.0  ;;  %v1099_v62 = vadd.f32 %v1095_v16, %v1087_v61  ;;  %v1186_v25 = vsel %vm1184_vm1, %v1179_v59, 0.0  ;;  %v1187_v9 = vsel %vm1185_vm4, %v1180_v6, 0.0 }
 0x25d   : > { %v1098_v0 = vadd.f32 %v1094_v30, %v1086_v60  ;;  %vm1270_vm10 = vmand %vm556_vm7, %vm553_vm11  ;;  %v1156_v43 = vrot.slane %v3060_v58, 1  ;;  %v1157_v12 = vrot.slane %v3087_v13, 1  ;;  %v1168_v15 = vrot.slane %v3062_v7, 2  ;;  %v1266_v36 = vpop.permute.xlu2 %1265 }
 0x25e   : > { %v1195_v53 = vstv %s3081_s6  ;;  %v1169_v27 = vrot.slane %v3089_v8, 2  ;;  %v1105_v18 = vadd.f32 %v2537_v50, %v1099_v62  ;;  %v1207_v3 = vstv %s3083_s22  ;;  %vm1225_vm5 = vmand %vm556_vm7, %vm551_vm8  ;;  %s3249_s6 = sld [smem:[#allocation10 + $0x14]] }
 0x25f   : > { %v1104_v39 = vadd.f32 %v2553_v54, %v1098_v0  ;;  %v1190_v23 = vmul.f32 %v1189_v29, %v1186_v25  ;;  %v1191_v28 = vmul.f32 %v1189_v29, %v1187_v9  ;;  %vm1267_vm13 = vcmp.lt.s32.totalorder %v2495_v34, 113  ;;  %vm1404_vm4 = vmand %vm556_vm7, %vm557_vm2  ;;  %s3255_s22 = sld [smem:[#allocation10 + $0x114]] }
 0x260   : > { %v1271_v58 = vsel %vm1270_vm10, 1, %v2181_v37  ;;  %v1117_v11 = vadd.f32 %v1113_v1, %v1105_v18  ;;  %v1196_v21 = vmul.f32 %v1195_v53, %v1186_v25  ;;  %v1197_v54 = vmul.f32 %v1195_v53, %v1187_v9 }
 0x261   : > { %v1116_v7 = vadd.f32 %v1112_v44, %v1104_v39  ;;  %v1208_v50 = vmul.f32 %v1207_v3, %v1186_v25  ;;  %v1209_v5 = vmul.f32 %v1207_v3, %v1187_v9  ;;  %v1272_v45 = vperm.slane %v1271_v58, 0 }
 0x262   : > { %v1273_v40 = vperm.slane %v1271_v58, 1  ;;  %v1129_v55 = vadd.f32 %v1125_v4, %v1117_v11  ;;  %v1279_v48 = vstv %s3091_s20  ;;  %v1268_v1 = vsel %vm1267_vm13, %v1264_v22, %v1266_v36  ;;  %s3264_s20 = sld [smem:[#allocation10 + $0x16]] }
 0x263   : > { %v1128_v19 = vadd.f32 %v1124_v24, %v1116_v7  ;;  %vm1274_vm3 = vcmp.eq.s32.totalorder %v1272_v45, 1  ;;  %v1285_v44 = vstv %s3104_s13  ;;  %v1269_v46 = vsel %vm1267_vm13, %v1266_v36, %v1264_v22  ;;  %s3281_s13 = sld [smem:[#allocation10 + $0x15]] }
 0x264   : > { %vm1275_vm12 = vcmp.eq.s32.totalorder %v1273_v40, 1  ;;  %v1149_v56 = vadd.f32 %v3068_v17, %v1129_v55  ;;  %v1276_v24 = vsel %vm1274_vm3, %v1268_v1, 0.0  ;;  %v1200_v4 = vrot.slane %v1196_v21, 1  ;;  %v1309_v21 = vpop.permute.xlu0 %1308 }
 0x265   : > { %v1148_v57 = vadd.f32 %v3058_v32, %v1128_v19  ;;  %v1277_v51 = vsel %vm1275_vm12, %v1269_v46, 0.0  ;;  %v1201_v26 = vrot.slane %v1197_v54, 1  ;;  %v1212_v47 = vrot.slane %v1208_v50, 2  ;;  %v3179_v22 = vpop.permute.xlu2 %1352  ;;  %vm3212_vm12 = vmand %vm556_vm7, %vm555_vm0 }
 0x266   : > { %v1297_v38 = vstv %s3114_s19  ;;  %v1161_v42 = vadd.f32 %v1157_v12, %v1149_v56  ;;  %v1213_v10 = vrot.slane %v1209_v5, 2  ;;  %vm1222_vm9 = vcmp.lt.s32.totalorder %v2495_v34, 114  ;;  %s3283_s19 = sld [smem:[#allocation10 + $0x95]] }
 0x267   : > { %v1160_v41 = vadd.f32 %v1156_v43, %v1148_v57  ;;  %v3150_v32 = vmul.f32 %v1279_v48, %v1276_v24  ;;  %v3152_v17 = vmul.f32 %v1279_v48, %v1277_v51  ;;  %v3154_v49 = vmul.f32 %v1285_v44, %v1276_v24 }
 0x268   : > { %v1226_v31 = vsel %vm1225_vm5, 1, %v2181_v37  ;;  %v1173_v2 = vadd.f32 %v1169_v27, %v1161_v42  ;;  %v3157_v35 = vmul.f32 %v1285_v44, %v1277_v51  ;;  %v3159_v13 = vmul.f32 %v1297_v38, %v1276_v24 }
 0x269   : > { %v1172_v33 = vadd.f32 %v1168_v15, %v1160_v41  ;;  %v1227_v8 = vperm.slane %v1226_v31, 0  ;;  %v1228_v60 = vperm.slane %v1226_v31, 1  ;;  %v1234_v61 = vstv %s3126_s3  ;;  %s3289_s3 = sld [smem:[#allocation10 + $0x115]] }
 0x26a   : > { %v1240_v30 = vstv %s3128_s5  ;;  %v1193_v29 = vadd.f32 %v1191_v28, %v1173_v2  ;;  %v1223_v59 = vsel %vm1222_vm9, %v3085_v14, %v1221_v52  ;;  %v1224_v6 = vsel %vm1222_vm9, %v1221_v52, %v3085_v14  ;;  %v1311_v14 = vpop.permute.xlu1 %1310  ;;  %s3314_s5 = sld [smem:[#allocation10 + $0x97]] }
 0x26b   : > { %v1192_v16 = vadd.f32 %v1190_v23, %v1172_v33  ;;  %vm1229_vm14 = vcmp.eq.s32.totalorder %v1227_v8, 1  ;;  %vm1230_vm15 = vcmp.eq.s32.totalorder %v1228_v60, 1  ;;  %v1252_v0 = vstv %s3140_s16  ;;  %s3322_s16 = sld [smem:[#allocation10 + $0x17]] }
 0x26c   : > { %v1315_v62 = vsel %vm556_vm7, 1, %v2181_v37  ;;  %v1205_v9 = vadd.f32 %v1201_v26, %v1193_v29  ;;  %v1231_v43 = vsel %vm1229_vm14, %v1223_v59, 0.0  ;;  %v1232_v12 = vsel %vm1230_vm15, %v1224_v6, 0.0 }
 0x26d   : > { %v1204_v25 = vadd.f32 %v1200_v4, %v1192_v16  ;;  %v1235_v15 = vmul.f32 %v1234_v61, %v1231_v43  ;;  %v1236_v53 = vmul.f32 %v1234_v61, %v1232_v12  ;;  %v1241_v27 = vmul.f32 %v1240_v30, %v1231_v43  ;;  %v1400_v29 = vpop.permute.xlu2 %1399 }
 0x26e   : > { %v1242_v39 = vmul.f32 %v1240_v30, %v1232_v12  ;;  %v1217_v3 = vadd.f32 %v1213_v10, %v1205_v9  ;;  %v1253_v23 = vmul.f32 %v1252_v0, %v1231_v43  ;;  %v1254_v28 = vmul.f32 %v1252_v0, %v1232_v12 }
 0x26f   : > { %v1216_v18 = vadd.f32 %v1212_v47, %v1204_v25  ;;  %v1299_v58 = vmul.f32 %v1297_v38, %v1277_v51  ;;  %vm1312_vm1 = vcmp.lt.s32.totalorder %v2495_v34, 112  ;;  %v1316_v7 = vperm.slane %v1315_v62, 0  ;;  %v1355_v25 = vpop.permute.xlu0 %1354 }
 0x270   : > { %v1317_v11 = vperm.slane %v1315_v62, 1  ;;  %v1238_v50 = vadd.f32 %v1236_v53, %v1217_v3  ;;  %v1245_v5 = vrot.slane %v1241_v27, 1  ;;  %v1246_v36 = vrot.slane %v1242_v39, 1 }
 0x271   : > { %v1237_v54 = vadd.f32 %v1235_v15, %v1216_v18  ;;  %v1257_v45 = vrot.slane %v1253_v23, 2  ;;  %v1258_v40 = vrot.slane %v1254_v28, 2  ;;  %vm1318_vm10 = vcmp.eq.s32.totalorder %v1316_v7, 1 }
 0x272   : > { %vm1319_vm13 = vcmp.eq.s32.totalorder %v1317_v11, 1  ;;  %v1250_v55 = vadd.f32 %v1246_v36, %v1238_v50  ;;  %v1329_v48 = vstv %s3169_s7  ;;  %v1313_v1 = vsel %vm1312_vm1, %v1309_v21, %v1311_v14  ;;  %v1398_v60 = vpop.permute.xlu1 %1397  ;;  %s3324_s7 = sld [smem:[#allocation10 + $0x117]] }
 0x273   : > { %v1249_v19 = vadd.f32 %v1245_v5, %v1237_v54  ;;  %v1290_v44 = vrot.slane %v3154_v49, 1  ;;  %v1314_v46 = vsel %vm1312_vm1, %v1311_v14, %v1309_v21  ;;  %v1320_v57 = vsel %vm1318_vm10, %v1313_v1, 0.0 }
 0x274   : > { %v1405_v56 = vsel %vm1404_vm4, 1, %v2181_v37  ;;  %v1262_v51 = vadd.f32 %v1258_v40, %v1250_v55  ;;  %v1323_v4 = vstv %s3175_s0  ;;  %v1321_v26 = vsel %vm1319_vm13, %v1314_v46, 0.0  ;;  %s3336_s0 = sld [smem:[#allocation10 + $0x18]] }
 0x275   : > { %v1261_v24 = vadd.f32 %v1257_v45, %v1249_v19  ;;  %v1291_v47 = vrot.slane %v3157_v35, 1  ;;  %v1302_v38 = vrot.slane %v3159_v13, 2  ;;  %v1341_v52 = vstv %s3177_s12  ;;  %s3342_s12 = sld [smem:[#allocation10 + $0x98]] }
 0x276   : > { %v1330_v41 = vmul.f32 %v1329_v48, %v1320_v57  ;;  %v1303_v42 = vrot.slane %v1299_v58, 2  ;;  %v1283_v49 = vadd.f32 %v3152_v17, %v1262_v51  ;;  %v1406_v31 = vperm.slane %v1405_v56, 0 }
 0x277   : > { %v1282_v10 = vadd.f32 %v3150_v32, %v1261_v24  ;;  %v1324_v33 = vmul.f32 %v1323_v4, %v1320_v57  ;;  %v1331_v2 = vmul.f32 %v1329_v48, %v1321_v26  ;;  %vm1401_vm3 = vcmp.lt.s32.totalorder %v2495_v34, 110 }
 0x278   : > { %v1407_v8 = vperm.slane %v1405_v56, 1  ;;  %v1295_v13 = vadd.f32 %v1291_v47, %v1283_v49  ;;  %v1325_v61 = vmul.f32 %v1323_v4, %v1321_v26  ;;  %v1342_v30 = vmul.f32 %v1341_v52, %v1320_v57 }
 0x279   : > { %v1294_v35 = vadd.f32 %v1290_v44, %v1282_v10  ;;  %v1334_v17 = vrot.slane %v1330_v41, 1  ;;  %v1343_v16 = vmul.f32 %v1341_v52, %v1321_v26  ;;  %vm1408_vm5 = vcmp.eq.s32.totalorder %v1406_v31, 1  ;;  %v1443_v52 = vpop.permute.xlu0 %1442  ;;  %v3258_v10 = vpop.permute.xlu2 %1487 }
 0x27a   : > { %vm1409_vm9 = vcmp.eq.s32.totalorder %v1407_v8, 1  ;;  %v1307_v6 = vadd.f32 %v1303_v42, %v1295_v13  ;;  %v1402_v0 = vsel %vm1401_vm3, %v1398_v60, %v1400_v29  ;;  %v1403_v62 = vsel %vm1401_vm3, %v1400_v29, %v1398_v60  ;;  %v1445_v4 = vpop.permute.xlu1 %1444 }
 0x27b   : > { %v1306_v59 = vadd.f32 %v1302_v38, %v1294_v35  ;;  %v1335_v9 = vrot.slane %v1331_v2, 1  ;;  %v1413_v43 = vstv %s3189_s21  ;;  %v1419_v12 = vstv %s3195_s30  ;;  %s3345_s21 = sld [smem:[#allocation10 + $0x118]]  ;;  %s1914_s30 = sshll.u32 %s2293_s10, 3 }
 0x27c   : > { %v1360_v15 = vsel %vm3212_vm12, 1, %v2181_v37  ;;  %v1327_v27 = vadd.f32 %v1325_v61, %v1307_v6  ;;  %v1410_v39 = vsel %vm1408_vm5, %v1402_v0, 0.0  ;;  %v1411_v14 = vsel %vm1409_vm9, %v1403_v62, 0.0  ;;  %s1712_s10 = scalar_lea.sflag [#allocation7], %s2368_s29 }
 0x27d   : > { %v1326_v53 = vadd.f32 %v1324_v33, %v1306_v59  ;;  %v1346_v18 = vrot.slane %v1342_v30, 2  ;;  %v1347_v3 = vrot.slane %v1343_v16, 2  ;;  %v1431_v23 = vstv %s3201_s15 }
 0x27e   : > { %vm1356_vm7 = vcmp.lt.s32.totalorder %v2495_v34, 111  ;;  %v1339_v58 = vadd.f32 %v1335_v9, %v1327_v27  ;;  %v1361_v7 = vperm.slane %v1360_v15, 0  ;;  %v1362_v11 = vperm.slane %v1360_v15, 1 }
 0x27f   : > { %v1338_v28 = vadd.f32 %v1334_v17, %v1326_v53  ;;  %v1414_v21 = vmul.f32 %v1413_v43, %v1410_v39  ;;  %v1415_v54 = vmul.f32 %v1413_v43, %v1411_v14  ;;  %v3231_v50 = vmul.f32 %v1419_v12, %v1410_v39 }
 0x280   : > { %v3233_v5 = vmul.f32 %v1419_v12, %v1411_v14  ;;  %v3235_v45 = vmul.f32 %v1431_v23, %v1410_v39  ;;  %vm1363_vm14 = vcmp.eq.s32.totalorder %v1361_v7, 1  ;;  %vm1364_vm15 = vcmp.eq.s32.totalorder %v1362_v11, 1 }
 0x281   : > { %v1350_v36 = vadd.f32 %v1346_v18, %v1338_v28  ;;  %v1368_v40 = vstv %s3206_s1  ;;  %v1374_v19 = vstv %s3216_s2  ;;  %v1386_v55 = vstv %s3218_s27  ;;  %s1723_s2 = scalar_lea.hbm %s3412_s11, %s1914_s30  ;;  %s3491_s27 = sshll.u32 %s2368_s29, 3 }
 0x282   : > { %v1357_v48 = vsel %vm1356_vm7, %v3179_v22, %v1355_v25  ;;  %v1351_v1 = vadd.f32 %v1347_v3, %v1339_v58  ;;  %v1358_v44 = vsel %vm1356_vm7, %v1355_v25, %v3179_v22  ;;  %vm558_vm1 = vcmp.lt.f32.partialorder %v3101_v20, 14.0  ;;  %v1533_v28 = vpop.permute.xlu1 %1532 }
 0x283   : > { %v1365_v46 = vsel %vm1363_vm14, %v1357_v48, 0.0  ;;  %v1366_v57 = vsel %vm1364_vm15, %v1358_v44, 0.0  ;;  %vm1449_vm4 = vmand %vm558_vm1, %vm551_vm8  ;;  %vm1446_vm10 = vcmp.lt.s32.totalorder %v2495_v34, 98  ;;  %v1433_v31 = vmul.f32 %v1431_v23, %v1411_v14 }
 0x284   : > { %v1369_v56 = vmul.f32 %v1368_v40, %v1365_v46  ;;  %v1375_v24 = vmul.f32 %v1374_v19, %v1365_v46  ;;  %v1387_v51 = vmul.f32 %v1386_v55, %v1365_v46  ;;  %v1370_v26 = vmul.f32 %v1368_v40, %v1366_v57  ;;  %vm1494_vm9 = vmand %vm558_vm1, %vm553_vm11 }
 0x285   : > { %v1376_v47 = vmul.f32 %v1374_v19, %v1366_v57  ;;  %v1388_v22 = vmul.f32 %v1386_v55, %v1366_v57  ;;  %v1450_v38 = vsel %vm1449_vm4, 1, %v2181_v37  ;;  %v1464_v30 = vstv %s3237_s4  ;;  %vm1583_vm11 = vmand %vm558_vm1, %vm555_vm0  ;;  %s414_s4 = scalar_lea.vmem [#allocation12], %s3491_s27 }
 0x286   : > { %v1371_v41 = vadd.f32 %v1369_v56, %v1350_v36  ;;  %v1379_v42 = vrot.slane %v1375_v24, 1  ;;  %v1451_v49 = vperm.slane %v1450_v38, 0  ;;  %v1372_v33 = vadd.f32 %v1370_v26, %v1351_v1 }
 0x287   : > { %v1380_v2 = vrot.slane %v1376_v47, 1  ;;  %v1452_v8 = vperm.slane %v1450_v38, 1  ;;  %v1391_v35 = vrot.slane %v1387_v51, 2  ;;  %v1392_v13 = vrot.slane %v1388_v22, 2 }
 0x288   : > { %v1383_v60 = vadd.f32 %v1379_v42, %v1371_v41  ;;  %vm1453_vm8 = vcmp.eq.s32.totalorder %v1451_v49, 1  ;;  %v1447_v32 = vsel %vm1446_vm10, %v1443_v52, %v1445_v4  ;;  %v1424_v17 = vrot.slane %v3231_v50, 1 }
 0x289   : > { %v1384_v61 = vadd.f32 %v1380_v2, %v1372_v33  ;;  %vm1454_vm13 = vcmp.eq.s32.totalorder %v1452_v8, 1  ;;  %v1448_v29 = vsel %vm1446_vm10, %v1445_v4, %v1443_v52  ;;  %v1455_v59 = vsel %vm1453_vm8, %v1447_v32, 0.0  ;;  %vm1628_vm10 = vmand %vm558_vm1, %vm557_vm2 }
 0x28a   : > { %v1395_v16 = vadd.f32 %v1391_v35, %v1383_v60  ;;  %v1425_v6 = vrot.slane %v3233_v5, 1  ;;  %v1458_v62 = vstv %s3249_s6  ;;  %v1456_v25 = vsel %vm1454_vm13, %v1448_v29, 0.0  ;;  %s1725_s6 = sshll.u32 %s414_s4, 4  ;;  %s1726_s6 = int_to_ptr.vmem [resolvable:$true] %s1725_s6 }
 0x28b   : > { %v1396_v0 = vadd.f32 %v1392_v13, %v1384_v61  ;;  %v1436_v9 = vrot.slane %v3235_v45, 2  ;;  %v1476_v12 = vstv %s3255_s22  ;;  %v1465_v15 = vmul.f32 %v1464_v30, %v1455_v59  ;;  %v1535_v45 = vpop.permute.xlu2 %1534  ;;  %s1727_s22 = sshll.u32 %s1723_s2, 4  ;;  %s1728_s22 = int_to_ptr.hbm [resolvable:$true] %s1727_s22 }
 0x28c   : > { %v1416_v43 = vadd.f32 %v1414_v21, %v1395_v16  ;;  %v1437_v53 = vrot.slane %v1433_v31, 2  ;;  %vm1536_vm3 = vcmp.lt.s32.totalorder %v2495_v34, 96  ;;  %v1539_v39 = vsel %vm558_vm1, 1, %v2181_v37  ;;  %v1490_v21 = vpop.permute.xlu0 %1489 }
 0x28d   : > { %v1417_v27 = vadd.f32 %v1415_v54, %v1396_v0  ;;  %v1459_v18 = vmul.f32 %v1458_v62, %v1455_v59  ;;  %v1466_v3 = vmul.f32 %v1464_v30, %v1456_v25  ;;  %v1540_v23 = vperm.slane %v1539_v39, 0 }
 0x28e   : > { %v1428_v14 = vadd.f32 %v1424_v17, %v1416_v43  ;;  %v1460_v7 = vmul.f32 %v1458_v62, %v1456_v25  ;;  %v1477_v11 = vmul.f32 %v1476_v12, %v1455_v59  ;;  %v1541_v50 = vperm.slane %v1539_v39, 1 }
 0x28f   : > { %v1429_v58 = vadd.f32 %v1425_v6, %v1417_v27  ;;  %v1469_v5 = vrot.slane %v1465_v15, 1  ;;  %v1478_v36 = vmul.f32 %v1476_v12, %v1456_v25  ;;  %vm1542_vm12 = vcmp.eq.s32.totalorder %v1540_v23, 1  ;;  %v1579_v15 = vpop.permute.xlu1 %1578 }
 0x290   : > { %v1440_v54 = vadd.f32 %v1436_v9, %v1428_v14  ;;  %vm1543_vm5 = vcmp.eq.s32.totalorder %v1541_v50, 1  ;;  %v1537_v19 = vsel %vm1536_vm3, %v1533_v28, %v1535_v45  ;;  %v1538_v55 = vsel %vm1536_vm3, %v1535_v45, %v1533_v28 }
 0x291   : > { %v1441_v40 = vadd.f32 %v1437_v53, %v1429_v58  ;;  %v1470_v1 = vrot.slane %v1466_v3, 1  ;;  %v1547_v44 = vstv %s3264_s20  ;;  %v1544_v46 = vsel %vm1542_vm12, %v1537_v19, 0.0  ;;  %s2110_s20 = sshra.s32 %s1728_s22, 4  ;;  %s2111_s20 = int_to_ptr.hbm [resolvable:$true] %s2110_s20 }
 0x292   : > { %v1461_v48 = vadd.f32 %v1459_v18, %v1440_v54  ;;  %v1553_v56 = vstv %s3269_s18  ;;  %v1565_v24 = vstv %s3273_s14  ;;  %v1545_v51 = vsel %vm1543_vm5, %v1538_v55, 0.0  ;;  %s2112_s18 = scalar_lea.hbm %s2111_s20, 8  ;;  %p2117_p9 = scmp.lt.s32.totalorder %s2111_s20, %s3412_s11 }
 0x293   : > { %v1462_v57 = vadd.f32 %v1460_v7, %v1441_v40  ;;  %v1481_v26 = vrot.slane %v1477_v11, 2  ;;  %v1482_v47 = vrot.slane %v1478_v36, 2  ;;  %v3298_v38 = vmul.f32 %v1547_v44, %v1544_v46  ;;  %p2113_p1 = scmp.ne.s32.totalorder %s2111_s20, %s2112_s18 }
 0x294   : > { %v1473_v4 = vadd.f32 %v1469_v5, %v1461_v48  ;;  %vm1491_vm7 = vcmp.lt.s32.totalorder %v2495_v34, 97  ;;  %v1495_v52 = vsel %vm1494_vm9, 1, %v2181_v37  ;;  %v3302_v41 = vmul.f32 %v1547_v44, %v1545_v51  ;;  %v1577_v16 = vpop.permute.xlu0 %1576 }
 0x295   : > { %v1474_v22 = vadd.f32 %v1470_v1, %v1462_v57  ;;  %v3304_v42 = vmul.f32 %v1553_v56, %v1544_v46  ;;  %v3306_v49 = vmul.f32 %v1553_v56, %v1545_v51  ;;  %v3308_v31 = vmul.f32 %v1565_v24, %v1544_v46  ;;  %p2114_p4 = pnand %p2113_p1, %p2341_p5 }
 0x296   : > { %v1485_v33 = vadd.f32 %v1481_v26, %v1473_v4  ;;  %v1496_v2 = vperm.slane %v1495_v52, 0  ;;  %v1497_v8 = vperm.slane %v1495_v52, 1  ;;  %v1503_v60 = vstv %s3281_s13  ;;  %v1622_v26 = vpop.permute.xlu2 %1621 }
 0x297   : > { %v1486_v35 = vadd.f32 %v1482_v47, %v1474_v22  ;;  %v1509_v13 = vstv %s3283_s19  ;;  %v1492_v61 = vsel %vm1491_vm7, %v3258_v10, %v1490_v21  ;;  %v1493_v30 = vsel %vm1491_vm7, %v1490_v21, %v3258_v10  ;;  %p2115_p8 = pneg %p2114_p4  ;;  %s2116_s19 = scalar_lea.hbm %s3412_s11, 16 }
 0x298   : > { %vm1498_vm14 = vcmp.eq.s32.totalorder %v1496_v2, 1  ;;  %vm1499_vm15 = vcmp.eq.s32.totalorder %v1497_v8, 1  ;;  %v1521_v32 = vstv %s3289_s3  ;;  %v1584_v17 = vsel %vm1583_vm11, 1, %v2181_v37  ;;  %p2118_p10 = scmp.lt.s32.totalorder %s2116_s19, %s2112_s18 }
 0x299   : > { %v1500_v29 = vsel %vm1498_vm14, %v1492_v61, 0.0  ;;  %v1501_v59 = vsel %vm1499_vm15, %v1493_v30, 0.0  ;;  %v1585_v6 = vperm.slane %v1584_v17, 0  ;;  %v1586_v0 = vperm.slane %v1584_v17, 1 }
 0x29a   : > { %v1504_v62 = vmul.f32 %v1503_v60, %v1500_v29  ;;  %v1505_v25 = vmul.f32 %v1503_v60, %v1501_v59  ;;  %v1510_v9 = vmul.f32 %v1509_v13, %v1500_v29  ;;  %v1511_v43 = vmul.f32 %v1509_v13, %v1501_v59  ;;  %p2119_p2 = por %p2118_p10, %p2117_p9 }
 0x29b   : > { %v1522_v10 = vmul.f32 %v1521_v32, %v1500_v29  ;;  %v1523_v12 = vmul.f32 %v1521_v32, %v1501_v59  ;;  %vm1580_vm0 = vcmp.lt.s32.totalorder %v2495_v34, 95  ;;  %vm3327_vm4 = vcmp.eq.s32.totalorder %v1585_v6, 1 }
 0x29c   : > { %v1506_v27 = vadd.f32 %v1504_v62, %v1485_v33  ;;  %v1507_v39 = vadd.f32 %v1505_v25, %v1486_v35  ;;  %v1514_v14 = vrot.slane %v1510_v9, 1  ;;  %v1515_v18 = vrot.slane %v1511_v43, 1  ;;  %v1624_v57 = vpop.permute.xlu0 %1623  ;;  %p2120_p11 = pnand %p2119_p2, %p2115_p8 }
 0x29d   : > { %v1526_v3 = vrot.slane %v1522_v10, 2  ;;  %v1527_v23 = vrot.slane %v1523_v12, 2  ;;  %vm1588_vm8 = vcmp.eq.s32.totalorder %v1586_v0, 1  ;;  %v1598_v28 = vstv %s3314_s5 }
 0x29e   : > { %v1518_v58 = vadd.f32 %v1514_v14, %v1506_v27  ;;  %v1519_v7 = vadd.f32 %v1515_v18, %v1507_v39  ;;  %v1581_v11 = vsel %vm1580_vm0, %v1577_v16, %v1579_v15  ;;  %v1582_v50 = vsel %vm1580_vm0, %v1579_v15, %v1577_v16 }
 0x29f   : > { %v1558_v21 = vrot.slane %v3304_v42, 1  ;;  %v1567_v54 = vmul.f32 %v1565_v24, %v1545_v51  ;;  %v1589_v63 = vsel %vm3327_vm4, %v1581_v11, 0.0  ;;  %v1629_v20 = vsel %vm1628_vm10, 1, %v2181_v37 }
 0x2a0   : > { %v1530_v5 = vadd.f32 %v1526_v3, %v1518_v58  ;;  %v1531_v36 = vadd.f32 %v1527_v23, %v1519_v7  ;;  %v1592_v45 = vstv %s3322_s16  ;;  %v1590_v40 = vsel %vm1588_vm8, %v1582_v50, 0.0 }
 0x2a1   : > { %v1559_v19 = vrot.slane %v3306_v49, 1  ;;  %v1610_v55 = vstv %s3324_s7  ;;  %v1599_v48 = vmul.f32 %v1598_v28, %v1589_v63  ;;  %vm1625_vm2 = vcmp.lt.s32.totalorder %v2495_v34, 94 }
 0x2a2   : > { %v1550_v1 = vadd.f32 %v3298_v38, %v1530_v5  ;;  %v1551_v44 = vadd.f32 %v3302_v41, %v1531_v36  ;;  %v1630_v46 = vperm.slane %v1629_v20, 0  ;;  %v1631_v37 = vperm.slane %v1629_v20, 1 }
 0x2a3   : > { %v1570_v56 = vrot.slane %v3308_v31, 2  ;;  %v1571_v24 = vrot.slane %v1567_v54, 2  ;;  %v1593_v51 = vmul.f32 %v1592_v45, %v1589_v63  ;;  %v1600_v4 = vmul.f32 %v1598_v28, %v1590_v40 }
 0x2a4   : > { %v1562_v47 = vadd.f32 %v1558_v21, %v1550_v1  ;;  %v1563_v22 = vadd.f32 %v1559_v19, %v1551_v44  ;;  %vm1632_vm1 = vcmp.eq.s32.totalorder %v1630_v46, 1  ;;  %vm1633_vm13 = vcmp.eq.s32.totalorder %v1631_v37, 1 }
 0x2a5   : > { %v1594_v52 = vmul.f32 %v1592_v45, %v1590_v40  ;;  %v1611_v38 = vmul.f32 %v1610_v55, %v1589_v63  ;;  %v1612_v42 = vmul.f32 %v1610_v55, %v1590_v40  ;;  %v1626_v41 = vsel %vm1625_vm2, %v1622_v26, %v1624_v57 }
 0x2a6   : > { %v1574_v49 = vadd.f32 %v1570_v56, %v1562_v47  ;;  %v1575_v33 = vadd.f32 %v1571_v24, %v1563_v22  ;;  %v1603_v31 = vrot.slane %v1599_v48, 1  ;;  %v1627_v2 = vsel %vm1625_vm2, %v1624_v57, %v1622_v26 }
 0x2a7   : > { %v1604_v8 = vrot.slane %v1600_v4, 1  ;;  %v1643_v60 = vstv %s3342_s12  ;;  %v1634_v35 = vsel %vm1632_vm1, %v1626_v41, 0.0  ;;  %v1635_v13 = vsel %vm1633_vm13, %v1627_v2, 0.0 }
 0x2a8   : > { %v1595_v61 = vadd.f32 %v1593_v51, %v1574_v49  ;;  %v1596_v30 = vadd.f32 %v1594_v52, %v1575_v33  ;;  %v1637_v32 = vstv %s3336_s0  ;;  %v1655_v17 = vstv %s3345_s21 }
 0x2a9   : > { %v1615_v16 = vrot.slane %v1611_v38, 2  ;;  %v1616_v29 = vrot.slane %v1612_v42, 2  ;;  %v1644_v0 = vmul.f32 %v1643_v60, %v1634_v35  ;;  %v1645_v62 = vmul.f32 %v1643_v60, %v1635_v13  ;;  %v2023_v60 = vld [vmem:[%s2374_s9] sm:$0xff] }
 0x2aa   : > { %v1607_v59 = vadd.f32 %v1603_v31, %v1595_v61  ;;  %v1608_v6 = vadd.f32 %v1604_v8, %v1596_v30  ;;  %v1638_v25 = vmul.f32 %v1637_v32, %v1634_v35  ;;  %v1656_v9 = vmul.f32 %v1655_v17, %v1634_v35 }
 0x2ab   : > { %v1639_v34 = vmul.f32 %v1637_v32, %v1635_v13  ;;  %v1657_v12 = vmul.f32 %v1655_v17, %v1635_v13  ;;  %v1648_v27 = vrot.slane %v1644_v0, 1  ;;  %v1649_v39 = vrot.slane %v1645_v62, 1 }
 0x2ac   : > { %v1619_v43 = vadd.f32 %v1615_v16, %v1607_v59  ;;  %v1620_v10 = vadd.f32 %v1616_v29, %v1608_v6  ;;  %v1660_v14 = vrot.slane %v1656_v9, 2  ;;  %v2205_v21 = vmov 256.0  }
 0x2ad   : > { %v1661_v18 = vrot.slane %v1657_v12, 2  ;;  %2018 = vrcp.f32 %v2205_v21 }
 0x2ae   : > { %v1640_v15 = vadd.f32 %v1638_v25, %v1619_v43  ;;  %v1641_v53 = vadd.f32 %v1639_v34, %v1620_v10 }
 0x2b0   : > { %v1652_v3 = vadd.f32 %v1648_v27, %v1640_v15  ;;  %v1653_v23 = vadd.f32 %v1649_v39, %v1641_v53 }
 0x2b2   : > { %v1664_v28 = vadd.f32 %v1660_v14, %v1652_v3  ;;  %v1665_v58 = vadd.f32 %v1661_v18, %v1653_v23 }
 0x2b3   : > { %v2019_v54 = vpop.eup %2018 }
 0x2b4   : > { %v1666_v7 = vsel %vm545_vm6, %v1664_v28, 0.0  ;;  %v1667_v11 = vsel %vm545_vm6, %v1665_v58, 0.0  ;;  %v1672_v63 = vmul.f32 256.0, %v2019_v54  ;;  %vm1676_vm3 = vweird.f32 %v2019_v54 }
 0x2b5   : > { %v1668_v50 = vadd.f32 %v1667_v11, %v1666_v7 }
 0x2b6   : > { %v1673_v20 = vsub.f32 1.0, %v1672_v63 }
 0x2b7   : > { %1669 = vadd.xlane.f32.xlu1 %v1668_v50 }
 0x2b8   : > { %v1674_v5 = vmul.f32 %v2019_v54, %v1673_v20 }
 0x2ba   : > { %v1675_v36 = vadd.f32 %v2019_v54, %v1674_v5 }
 0x2bc   : > { %v1677_v45 = vsel %vm1676_vm3, %v2019_v54, %v1675_v36 }
 0x32a   : > { %v1670_v40 = vpop.xlane.xlu1 %1669 }
 0x32b   : > { %v1678_v19 = vmul.f32 %v1677_v45, %v1670_v40 }
 0x32d   : > { %v1679_v55 = vsub.f32 %v1664_v28, %v1678_v19  ;;  %v1680_v48 = vsub.f32 %v1665_v58, %v1678_v19 }
 0x32f   : > { %v1681_v1 = vmul.f32 %v1679_v55, %v1679_v55  ;;  %v1682_v44 = vmul.f32 %v1680_v48, %v1680_v48 }
 0x331   : > { %v1683_v46 = vsel %vm545_vm6, %v1681_v1, 0.0  ;;  %v1684_v37 = vsel %vm545_vm6, %v1682_v44, 0.0  ;;  %vm3492_vm6 = vcmask 1043456  }
 0x332   : > { %v1685_v57 = vadd.f32 %v1684_v37, %v1683_v46 }
 0x334   : > { %1686 = vadd.xlane.f32.xlu2 %v1685_v57 }
 0x3a7   : > { %v1687_v56 = vpop.xlane.xlu2 %1686 }
 0x3a8   : > { %v1688_v24 = vmul.f32 %v1687_v56, %v1677_v45 }
 0x3aa   : > { %v1689_v51 = vadd.f32 1e-05, %v1688_v24 }
 0x3ac   : > { %2020 = vrsqrt.f32 %v1689_v51  ;;  %vm1696_vm5 = vweird.f32 %v1689_v51 }
 0x3b2   : > { %v2021_v4 = vpop.eup %2020 }
 0x3b3   : > { %v1691_v26 = vmul.f32 %v2021_v4, %v1689_v51  ;;  %vm1697_vm12 = vweird.f32 %v2021_v4 }
 0x3b4   : > { %vm1698_vm9 = vmor %vm1696_vm5, %vm1697_vm12 }
 0x3b5   : > { %v1692_v47 = vmul.f32 %v2021_v4, %v1691_v26 }
 0x3b7   : > { %v1693_v22 = vmul.f32 0.5, %v1692_v47 }
 0x3b9   : > { %v1694_v52 = vsub.f32 1.5, %v1693_v22 }
 0x3bb   : > { %v1695_v38 = vmul.f32 %v2021_v4, %v1694_v52 }
 0x3bd   : > { %v1699_v42 = vsel %vm1698_vm9, %v2021_v4, %v1695_v38 }
 0x3be   : > { %v1700_v41 = vmul.f32 %v1699_v42, %v1679_v55  ;;  %v1701_v49 = vmul.f32 %v1699_v42, %v1680_v48 }
 0x3c0   : > { %v1703_v33 = vperm.slane %v1701_v49, 0  ;;  %v1702_v31 = vperm.slane %v1700_v41, 0 }
 0x3c2   : > { %v1706_v2 = vrot.slane %v1703_v33, 4 }
 0x3c4   : > { %v1707_v8 = vsel %vm3492_vm6, %v1702_v31, %v1706_v2 }
 0x3c5   : > { %v1709_v35 = vmul.f32 %v2023_v60, %v1707_v8 }
 0x3c7   : > { %1710 = vst [vmem:[%s414_s4] sm:$0xff] %v1709_v35 }
 0x3c8   : > { %2123 = shalt.err (!%p2120_p11)
}
 0x3c9   : > { %1925 = dma.vmem_to_hbm [thread:$0]  (%p2341_p5), %s1726_s6, 128, %s1728_s22, %s1712_s10  }
 0x3ca PF: > { %s1739_s29 = sand.u32 1, %s2160_s23   ;;  %p3493_p12 = scmp.ge.s32.totalorder %s2172_s25, 2 }
 0x3cb   : > { %s1740_s9 = scalar_lea.sflag [#allocation7], %s1739_s29 }
 0x3cc   : > { %p1939_p13 = pnand %p3493_p12, %p2307_p6 }
 0x3ce   : > { %p1940_p0 = pneg %p1939_p13 }
 0x3d0   : > { %2155 = dma.done.wait (%p1940_p0), %s1740_s9, 128  }
 0x3d1   : > { %2157 = vsyncadd (%p1940_p0), %s1740_s9, 4294967168  ;;  %s3494_s16 = sld [smem:[#allocation18_spill]]  ;;  %p35_p3 = scmp.ge.s32.totalorder %s2328_s17, 4  }
 0x3d2   : > { %s3495_s0 = sld [smem:[#allocation19_spill]]  ;;  %s3496_s23 = smov %s2164_s24 }
 0x3d3   : > { %s3498_s25 = smov %s2328_s17  ;;  %37 = sbr.rel (!%p35_p3) target bundleno = 21 (0x15), region = 114 }
 0x3d7   : > { %s3497_s24 = smov %s3494_s16 }
 0x3d8   :  { %1746 = vsyncpa [#allocation6], 1 }
 0x3d9   :  { %1748 = vsyncpa [#allocation6 + $0x1], 1 }
 0x3da   :  { %1749 = vsyncpa [#allocation7], 1 }
 0x3db   :  { %1751 = vsyncpa [#allocation7 + $0x1], 1 }
 0x3dc   :  { %1752 = vsyncpa [#allocation8], 1 }
 0x3dd   :  { %1754 = vsyncpa [#allocation8 + $0x1], 1 }
 0x3de   :  { %1755 = vsyncpa [#allocation11], 1 }

</bundles_post_ra>
